<compile_context>
chip_gen: v6e
topology: v6e:2x2x1
jax: 0.10.0
libtpu: 0.0.40
codegen_flags: <defaults>
</compile_context>

<pallas_src>
import functools

import jax
import jax.numpy as jnp
from jax.experimental import pallas as pl
from jax.experimental.pallas import tpu as pltpu

_ACT_DTYPE = jnp.bfloat16           # HBM activations / intermediates
_WEIGHT_DTYPE = jnp.bfloat16        # MXU operands (accumulation is always f32)
_VMEM_LIMIT = 48 * 1024 * 1024      # safe under v7x's 64 MiB physical VMEM


# --------------------------------------------------------------------------
# Kernel AB: fused [bran1 3x3 s2 | bran2a 3x3 s2] -> block-diag 1x1(+BN) -> PReLU
# --------------------------------------------------------------------------
def _ab_kernel(ph_ref, w3_ref, w1_ref, bias_ref, alpha_ref, o_ref, *,
               Ho, Wo, lane_dense):
    Cin = ph_ref.shape[-1]
    M = Ho * Wo

    # im2col in VMEM: 9 contiguous (Ho, Wo, Cin) taps gathered from the 2x2
    # phase-split padded input, folded into the contraction dimension (bf16).
    taps = []
    for kh in range(3):
        for kw in range(3):
            p = (kh % 2) * 2 + (kw % 2)            # phase index
            oh, ow = kh // 2, kw // 2              # offset inside the phase
            taps.append(ph_ref[p, oh:oh + Ho, ow:ow + Wo, :])
    slab = jnp.concatenate(taps, axis=-1).reshape(M, 9 * Cin)          # (M, 9Cin) bf16

    # Both grouped 3x3 convs in ONE MXU dot (concatenated block-diagonal weight).
    mid = jnp.dot(slab, w3_ref[...], preferred_element_type=jnp.float32)   # (M, 6c)

    # Both 1x1 convs (+ folded BN scale) in ONE block-diagonal MXU dot.
    y = jnp.dot(mid.astype(w1_ref.dtype), w1_ref[...],
                preferred_element_type=jnp.float32)                        # (M, 4c)
    y = y + bias_ref[...]
    y = jnp.where(y > 0.0, y, alpha_ref[...] * y)   # per-column PReLU (two alphas)

    cout = y.shape[-1]
    if lane_dense:
        y = y.reshape(Ho, Wo * cout)                # lane-dense (last dim multiple of 128)
    o_ref[0] = y.astype(o_ref.dtype)


def _fused_ab(phases, prep, *, N, Ho, Wo, lane_dense):
    _, Hph, Wph, Cin = phases.shape
    M = Ho * Wo
    cmid = prep["w3_ab"].shape[1]
    cout = prep["w1_ab"].shape[1]
    out_inner = (Ho, Wo * cout) if lane_dense else (M, cout)

    flops = int(N * 2 * M * (9 * Cin * cmid + cmid * cout))
    bytes_acc = int(phases.size * phases.dtype.itemsize
                    + prep["w3_ab"].size * prep["w3_ab"].dtype.itemsize
                    + prep["w1_ab"].size * prep["w1_ab"].dtype.itemsize
                    + N * M * cout * jnp.dtype(_ACT_DTYPE).itemsize)

    kern = functools.partial(_ab_kernel, Ho=Ho, Wo=Wo, lane_dense=lane_dense)
    return pl.pallas_call(
        kern,
        out_shape=jax.ShapeDtypeStruct((N,) + out_inner, _ACT_DTYPE),
        grid=(N,),
        in_specs=[
            pl.BlockSpec((4, Hph, Wph, Cin), lambda n: (n, 0, 0, 0)),
            pl.BlockSpec(prep["w3_ab"].shape, lambda n: (0, 0)),
            pl.BlockSpec(prep["w1_ab"].shape, lambda n: (0, 0)),
            pl.BlockSpec(prep["bias_ab"].shape, lambda n: (0, 0)),
            pl.BlockSpec(prep["alpha_ab"].shape, lambda n: (0, 0)),
        ],
        out_specs=pl.BlockSpec((1,) + out_inner, lambda n: (n, 0, 0)),
        compiler_params=pltpu.CompilerParams(
            dimension_semantics=("parallel",),
            vmem_limit_bytes=_VMEM_LIMIT),
        cost_estimate=pl.CostEstimate(flops=flops, transcendentals=0,
                                      bytes_accessed=bytes_acc),
    )(phases, prep["w3_ab"], prep["w1_ab"], prep["bias_ab"], prep["alpha_ab"])


# --------------------------------------------------------------------------
# Kernel C: bran2b gconv3x3 s1 (halo in VMEM) -> 1x1(+BN) -> + bran1 -> PReLU
# --------------------------------------------------------------------------
def _c_kernel(ab_ref, w3_ref, w1_ref, bias_ref, alpha_ref, o_ref, pad_ref, *,
              Ho, Wo, c1, lane_dense):
    M = Ho * Wo
    blk = ab_ref[0]                                  # (Ho, Wo, 4c) bf16: [bran1 | y2]
    res = blk[:, :, :c1].reshape(M, c1)              # bran1 residual (layout-safe reshape)

    # 1-pixel halo for the stride-1 3x3 conv, built in VMEM (no padded HBM copy).
    pad_ref[...] = jnp.zeros(pad_ref.shape, pad_ref.dtype)
    pad_ref[1:1 + Ho, 1:1 + Wo, :] = blk[:, :, c1:]

    taps = [pad_ref[kh:kh + Ho, kw:kw + Wo, :]
            for kh in range(3) for kw in range(3)]
    slab = jnp.concatenate(taps, axis=-1).reshape(M, 9 * c1)           # (M, 9*c1) bf16

    mid = jnp.dot(slab, w3_ref[...], preferred_element_type=jnp.float32)   # (M, 4c)
    y = jnp.dot(mid.astype(w1_ref.dtype), w1_ref[...],
                preferred_element_type=jnp.float32)                        # (M, 2c)
    y = y + bias_ref[...] + res.astype(jnp.float32)
    y = jnp.where(y > 0.0, y, alpha_ref[...] * y)

    if lane_dense:
        y = y.reshape(Ho, Wo * c1)
    o_ref[0] = y.astype(o_ref.dtype)


def _fused_c(ab, prep, *, N, Ho, Wo, c1, lane_dense):
    M = Ho * Wo
    c_ab = ab.shape[-1]
    cmid = prep["w3_c"].shape[1]
    out_inner = (Ho, Wo * c1) if lane_dense else (M, c1)

    flops = int(N * 2 * M * (9 * c1 * cmid + cmid * c1))
    bytes_acc = int(ab.size * ab.dtype.itemsize
                    + prep["w3_c"].size * prep["w3_c"].dtype.itemsize
                    + prep["w1_c"].size * prep["w1_c"].dtype.itemsize
                    + N * M * c1 * 4)

    kern = functools.partial(_c_kernel, Ho=Ho, Wo=Wo, c1=c1, lane_dense=lane_dense)
    return pl.pallas_call(
        kern,
        out_shape=jax.ShapeDtypeStruct((N,) + out_inner, jnp.float32),
        grid=(N,),
        in_specs=[
            pl.BlockSpec((1, Ho, Wo, c_ab), lambda n: (n, 0, 0, 0)),
            pl.BlockSpec(prep["w3_c"].shape, lambda n: (0, 0)),
            pl.BlockSpec(prep["w1_c"].shape, lambda n: (0, 0)),
            pl.BlockSpec(prep["bias_c"].shape, lambda n: (0, 0)),
            pl.BlockSpec(prep["alpha_c"].shape, lambda n: (0, 0)),
        ],
        out_specs=pl.BlockSpec((1,) + out_inner, lambda n: (n, 0, 0)),
        scratch_shapes=[pltpu.VMEM((Ho + 2, Wo + 2, c1), _ACT_DTYPE)],
        compiler_params=pltpu.CompilerParams(
            dimension_semantics=("parallel",),
            vmem_limit_bytes=_VMEM_LIMIT),
        cost_estimate=pl.CostEstimate(flops=flops, transcendentals=0,
                                      bytes_accessed=bytes_acc),
    )(ab, prep["w3_c"], prep["w1_c"], prep["bias_c"], prep["alpha_c"])


# --------------------------------------------------------------------------
# Wrapper glue: pad + 2x2 phase-split (O(input) bytes, read once by kernel AB)
# --------------------------------------------------------------------------
def _phase_split2(x_nhwc):
    """Pad (3x3, pad=1, stride=2) and split into 2x2 phases so every conv tap is a
    contiguous (Ho, Wo) window inside the kernel."""
    N, H, W, C = x_nhwc.shape
    Ho, Wo = (H - 1) // 2 + 1, (W - 1) // 2 + 1
    pad_h, pad_w = (-(H + 2)) % 2, (-(W + 2)) % 2
    xp = jnp.pad(x_nhwc, ((0, 0), (1, 1 + pad_h), (1, 1 + pad_w), (0, 0)))
    Hph, Wph = Ho + 1, Wo + 1
    phases = jnp.stack([xp[:, i::2, j::2, :][:, :Hph, :Wph, :]
                        for i in range(2) for j in range(2)], axis=1)
    return phases.reshape(N * 4, Hph, Wph, C), Ho, Wo


@functools.partial(jax.jit, static_argnames=("lane_dense",))
def downsample_block_forward(prep, x_nchw, *, lane_dense=True):
    x = jnp.transpose(x_nchw, (0, 2, 3, 1)).astype(_ACT_DTYPE)   # NCHW -> NHWC bf16
    N = x.shape[0]
    c_ab = prep["w1_ab"].shape[1]          # 4 * chan (bran1 | bran2a)
    c1 = prep["w1_c"].shape[1]             # 2 * chan (block output channels)

    phases, Ho, Wo = _phase_split2(x)

    # kernel AB: both stride-2 branches, one HBM read of the phase-split input.
    ab = _fused_ab(phases, prep, N=N, Ho=Ho, Wo=Wo, lane_dense=lane_dense)
    ab = ab.reshape(N, Ho, Wo, c_ab)       # free metadata reshape (same row-major bytes)

    # kernel C: bran2b + residual merge + final PReLU.
    out = _fused_c(ab, prep, N=N, Ho=Ho, Wo=Wo, c1=c1, lane_dense=lane_dense)
    out = out.reshape(N, Ho, Wo, c1)
    return jnp.transpose(out, (0, 3, 1, 2))                       # NHWC -> NCHW


# --------------------------------------------------------------------------
# Weight preparation (done once, outside the jitted forward)
# --------------------------------------------------------------------------
def _prep_gconv_weight(w_oihw, groups):
    """Torch grouped-conv weight (Cout, Cin/G, 3, 3) -> tap-major block-diagonal dense
    matrix (9*Cin, Cout) in f32: one MXU dot implements the whole grouped conv."""
    Cout, cig, KH, KW = w_oihw.shape
    cog = Cout // groups
    Cin = cig * groups
    wd = jnp.zeros((Cout, Cin, KH, KW), jnp.float32)
    for g in range(groups):
        wd = wd.at[g * cog:(g + 1) * cog, g * cig:(g + 1) * cig].set(
            w_oihw[g * cog:(g + 1) * cog])
    return jnp.transpose(wd, (2, 3, 1, 0)).reshape(KH * KW * Cin, Cout)


def _prep_pw_bn(w_oi11, bn, eps=1e-5):
    """1x1 weight (Cout, Cin, 1, 1) + eval-mode BN -> scale-folded (Cin, Cout) f32 weight
    and f32 bias (Cout,)."""
    scale = bn["gamma"] / jnp.sqrt(bn["var"] + eps)
    bias = bn["beta"] - bn["mean"] * scale
    w = jnp.transpose(w_oi11[:, :, 0, 0], (1, 0)) * scale[None, :]
    return w, bias


def prepare_block(params):
    G = params["G"]
    chan = params["b1_conv3"].shape[0] // 2
    c1 = 2 * chan

    # fused AB: concatenated 3x3 block-diagonal weight (9*Cin, 6*chan)
    w3_ab = jnp.concatenate([_prep_gconv_weight(params["b1_conv3"], G),
                             _prep_gconv_weight(params["b2_conv3a"], G)], axis=1)
    # fused AB: block-diagonal 1x1(+BN) weight (6*chan, 4*chan), concatenated bias/alpha
    w1a, b1a = _prep_pw_bn(params["b1_conv1"], params["b1_bn"])
    w2a, b2a = _prep_pw_bn(params["b2_conv1a"], params["b2_bna"])
    w1_ab = jnp.zeros((6 * chan, 4 * chan), jnp.float32)
    w1_ab = w1_ab.at[:c1, :c1].set(w1a)
    w1_ab = w1_ab.at[c1:, c1:].set(w2a)
    bias_ab = jnp.concatenate([b1a, b2a])[None, :]
    alpha_ab = jnp.concatenate([jnp.full((c1,), params["b1_alpha"][0]),
                                jnp.full((c1,), params["b2_alpha"][0])])[None, :]

    # kernel C: bran2b
    w3_c = _prep_gconv_weight(params["b2_conv3b"], G)
    w1_c, bias_c = _prep_pw_bn(params["b2_conv1b"], params["b2_bnb"])
    alpha_c = jnp.full((1, c1), params["out_alpha"][0], jnp.float32)

    return dict(
        w3_ab=w3_ab.astype(_WEIGHT_DTYPE), w1_ab=w1_ab.astype(_WEIGHT_DTYPE),
        bias_ab=bias_ab.astype(jnp.float32), alpha_ab=alpha_ab.astype(jnp.float32),
        w3_c=w3_c.astype(_WEIGHT_DTYPE), w1_c=w1_c.astype(_WEIGHT_DTYPE),
        bias_c=bias_c[None, :].astype(jnp.float32), alpha_c=alpha_c,
    )


# --------------------------------------------------------------------------
# Parameter setup (deterministic, torch layouts)
# --------------------------------------------------------------------------
def init_params(key, chan, group_size):
    G = chan // group_size
    ks = iter(jax.random.split(key, 16))

    def w_conv(cout, cin_per_group, ksz, kk):
        fan_in = cin_per_group * ksz * ksz
        return (jax.random.normal(kk, (cout, cin_per_group, ksz, ksz), jnp.float32)
                / jnp.sqrt(fan_in))

    def bn_params(c, kk):
        k1, k2, k3, k4 = jax.random.split(kk, 4)
        return dict(
            gamma=jax.random.uniform(k1, (c,), jnp.float32, 0.5, 1.5),
            beta=jax.random.normal(k2, (c,), jnp.float32) * 0.1,
            mean=jax.random.normal(k3, (c,), jnp.float32) * 0.1,
            var=jax.random.uniform(k4, (c,), jnp.float32, 0.5, 1.5),
        )

    p = dict(G=G)
    p["b1_conv3"] = w_conv(2 * chan, chan // G, 3, next(ks))
    p["b1_conv1"] = w_conv(2 * chan, 2 * chan, 1, next(ks))
    p["b1_bn"] = bn_params(2 * chan, next(ks))
    p["b1_alpha"] = jnp.full((1,), 0.25, jnp.float32)     # nn.PReLU() scalar alpha
    p["b2_conv3a"] = w_conv(4 * chan, chan // G, 3, next(ks))
    p["b2_conv1a"] = w_conv(2 * chan, 4 * chan, 1, next(ks))
    p["b2_bna"] = bn_params(2 * chan, next(ks))
    p["b2_alpha"] = jnp.full((1,), 0.20, jnp.float32)
    p["b2_conv3b"] = w_conv(4 * chan, 2 * chan // G, 3, next(ks))
    p["b2_conv1b"] = w_conv(2 * chan, 4 * chan, 1, next(ks))
    p["b2_bnb"] = bn_params(2 * chan, next(ks))
    p["out_alpha"] = jnp.full((1,), 0.30, jnp.float32)
    return p


# --------------------------------------------------------------------------
# Pure-JAX f32 reference (correctness check only)
# --------------------------------------------------------------------------
def reference_forward(params, x_nchw):
    def conv(x, w, stride, pad, groups):
        return jax.lax.conv_general_dilated(
            x, w, window_strides=(stride, stride),
            padding=[(pad, pad), (pad, pad)],
            feature_group_count=groups,
            dimension_numbers=("NCHW", "OIHW", "NCHW"),
            precision=jax.lax.Precision.HIGHEST)

    def bn(x, p, eps=1e-5):
        s = p["gamma"] / jnp.sqrt(p["var"] + eps)
        b = p["beta"] - p["mean"] * s
        return x * s[None, :, None, None] + b[None, :, None, None]

    def prelu(x, a):
        return jnp.where(x > 0, x, a * x)

    G = params["G"]
    y1 = conv(x_nchw, params["b1_conv3"], 2, 1, G)
    y1 = prelu(bn(conv(y1, params["b1_conv1"], 1, 0, 1), params["b1_bn"]),
               params["b1_alpha"][0])
    y2 = conv(x_nchw, params["b2_conv3a"], 2, 1, G)
    y2 = prelu(bn(conv(y2, params["b2_conv1a"], 1, 0, 1), params["b2_bna"]),
               params["b2_alpha"][0])
    y2 = conv(y2, params["b2_conv3b"], 1, 1, G)
    y2 = bn(conv(y2, params["b2_conv1b"], 1, 0, 1), params["b2_bnb"])
    return prelu(y1 + y2, params["out_alpha"][0])


if __name__ == "__main__":
    chan, group_size = 8, 4          # chan % group_size == 0 -> groups = 2
    N, H, W = 2, 16, 16

    key = jax.random.PRNGKey(0)
    kx, kp = jax.random.split(key)
    x = jax.random.normal(kx, (N, chan, H, W), jnp.float32)
    params = init_params(kp, chan, group_size)
    prep = prepare_block(params)

    try:
        out = jax.block_until_ready(downsample_block_forward(prep, x, lane_dense=True))
    except Exception:
        # TODO(synk): lane-dense stores need a minor-dim-changing reshape relayout; on
        # Mosaic versions that reject it, fall back to the masked (M, C) store layout.
        out = jax.block_until_ready(downsample_block_forward(prep, x, lane_dense=False))

    assert out.shape == (N, 2 * chan, H // 2, W // 2), out.shape

    ref = jax.block_until_ready(reference_forward(params, x))
    denom = float(jnp.max(jnp.abs(ref))) + 1e-6
    rel_err = float(jnp.max(jnp.abs(out - ref))) / denom
    assert rel_err < 5e-2, f"mismatch vs reference, rel err={rel_err}"

    print("KERNEL_OK")
</pallas_src>

<mosaic_0001>
module attributes {stable_mosaic.version = 11 : i64} {
  func.func @_ab_kernel(%arg0: i32, %arg1: memref<4x9x9x8xbf16, #tpu.memory_space<vmem>>, %arg2: memref<72x48xbf16, #tpu.memory_space<vmem>>, %arg3: memref<48x32xbf16, #tpu.memory_space<vmem>>, %arg4: memref<1x32xf32, #tpu.memory_space<vmem>>, %arg5: memref<1x32xf32, #tpu.memory_space<vmem>>, %arg6: memref<1x8x256xbf16, #tpu.memory_space<vmem>>) attributes {dimension_semantics = [#tpu.dimension_semantics<parallel>], iteration_bounds = array<i64: 2>, scalar_prefetch = 0 : i64, scratch_operands = 0 : i64, tpu.core_type = #tpu.core_type<tc>, window_params = [{transform_indices = @transform_0, window_bounds = array<i64: 4, 9, 9, 8>}, {pipeline_mode = #tpu.pipeline_mode<synchronous>, transform_indices = @transform_1, window_bounds = array<i64: 72, 48>}, {pipeline_mode = #tpu.pipeline_mode<synchronous>, transform_indices = @transform_2, window_bounds = array<i64: 48, 32>}, {pipeline_mode = #tpu.pipeline_mode<synchronous>, transform_indices = @transform_3, window_bounds = array<i64: 1, 32>}, {pipeline_mode = #tpu.pipeline_mode<synchronous>, transform_indices = @transform_4, window_bounds = array<i64: 1, 32>}, {transform_indices = @transform_5, window_bounds = array<i64: 1, 8, 256>}]} {
    %c0 = arith.constant 0 : index
    %c0_0 = arith.constant 0 : index
    %c0_1 = arith.constant 0 : index
    %c0_2 = arith.constant 0 : index
    %0 = vector.load %arg1[%c0, %c0_0, %c0_1, %c0_2] : memref<4x9x9x8xbf16, #tpu.memory_space<vmem>>, vector<1x8x8x8xbf16>
    %1 = vector.shape_cast %0 : vector<1x8x8x8xbf16> to vector<8x8x8xbf16>
    %c1 = arith.constant 1 : index
    %c0_3 = arith.constant 0 : index
    %c0_4 = arith.constant 0 : index
    %c0_5 = arith.constant 0 : index
    %2 = vector.load %arg1[%c1, %c0_3, %c0_4, %c0_5] : memref<4x9x9x8xbf16, #tpu.memory_space<vmem>>, vector<1x8x8x8xbf16>
    %3 = vector.shape_cast %2 : vector<1x8x8x8xbf16> to vector<8x8x8xbf16>
    %c0_6 = arith.constant 0 : index
    %c0_7 = arith.constant 0 : index
    %c1_8 = arith.constant 1 : index
    %c0_9 = arith.constant 0 : index
    %4 = vector.load %arg1[%c0_6, %c0_7, %c1_8, %c0_9] : memref<4x9x9x8xbf16, #tpu.memory_space<vmem>>, vector<1x8x8x8xbf16>
    %5 = vector.shape_cast %4 : vector<1x8x8x8xbf16> to vector<8x8x8xbf16>
    %c2 = arith.constant 2 : index
    %c0_10 = arith.constant 0 : index
    %c0_11 = arith.constant 0 : index
    %c0_12 = arith.constant 0 : index
    %6 = vector.load %arg1[%c2, %c0_10, %c0_11, %c0_12] : memref<4x9x9x8xbf16, #tpu.memory_space<vmem>>, vector<1x8x8x8xbf16>
    %7 = vector.shape_cast %6 : vector<1x8x8x8xbf16> to vector<8x8x8xbf16>
    %c3 = arith.constant 3 : index
    %c0_13 = arith.constant 0 : index
    %c0_14 = arith.constant 0 : index
    %c0_15 = arith.constant 0 : index
    %8 = vector.load %arg1[%c3, %c0_13, %c0_14, %c0_15] : memref<4x9x9x8xbf16, #tpu.memory_space<vmem>>, vector<1x8x8x8xbf16>
    %9 = vector.shape_cast %8 : vector<1x8x8x8xbf16> to vector<8x8x8xbf16>
    %c2_16 = arith.constant 2 : index
    %c0_17 = arith.constant 0 : index
    %c1_18 = arith.constant 1 : index
    %c0_19 = arith.constant 0 : index
    %10 = vector.load %arg1[%c2_16, %c0_17, %c1_18, %c0_19] : memref<4x9x9x8xbf16, #tpu.memory_space<vmem>>, vector<1x8x8x8xbf16>
    %11 = vector.shape_cast %10 : vector<1x8x8x8xbf16> to vector<8x8x8xbf16>
    %c0_20 = arith.constant 0 : index
    %c1_21 = arith.constant 1 : index
    %c0_22 = arith.constant 0 : index
    %c0_23 = arith.constant 0 : index
    %12 = vector.load %arg1[%c0_20, %c1_21, %c0_22, %c0_23] : memref<4x9x9x8xbf16, #tpu.memory_space<vmem>>, vector<1x8x8x8xbf16>
    %13 = vector.shape_cast %12 : vector<1x8x8x8xbf16> to vector<8x8x8xbf16>
    %c1_24 = arith.constant 1 : index
    %c1_25 = arith.constant 1 : index
    %c0_26 = arith.constant 0 : index
    %c0_27 = arith.constant 0 : index
    %14 = vector.load %arg1[%c1_24, %c1_25, %c0_26, %c0_27] : memref<4x9x9x8xbf16, #tpu.memory_space<vmem>>, vector<1x8x8x8xbf16>
    %15 = vector.shape_cast %14 : vector<1x8x8x8xbf16> to vector<8x8x8xbf16>
    %c0_28 = arith.constant 0 : index
    %c1_29 = arith.constant 1 : index
    %c1_30 = arith.constant 1 : index
    %c0_31 = arith.constant 0 : index
    %16 = vector.load %arg1[%c0_28, %c1_29, %c1_30, %c0_31] : memref<4x9x9x8xbf16, #tpu.memory_space<vmem>>, vector<1x8x8x8xbf16>
    %17 = vector.shape_cast %16 : vector<1x8x8x8xbf16> to vector<8x8x8xbf16>
    %18 = tpu.concatenate %1, %3, %5, %7, %9, %11, %13, %15, %17 in 2 : vector<8x8x8xbf16>, vector<8x8x8xbf16>, vector<8x8x8xbf16>, vector<8x8x8xbf16>, vector<8x8x8xbf16>, vector<8x8x8xbf16>, vector<8x8x8xbf16>, vector<8x8x8xbf16>, vector<8x8x8xbf16> -> vector<8x8x72xbf16>
    %19 = vector.shape_cast %18 : vector<8x8x72xbf16> to vector<64x72xbf16>
    %c0_32 = arith.constant 0 : index
    %c0_33 = arith.constant 0 : index
    %20 = vector.load %arg2[%c0_32, %c0_33] : memref<72x48xbf16, #tpu.memory_space<vmem>>, vector<72x48xbf16>
    %cst = arith.constant dense<0.000000e+00> : vector<64x48xf32>
    %21 = tpu.matmul %19, %20, %cst {dimension_numbers = #tpu.dot_dimension_numbers<[1], [0], [0], [1], [0, 0, 1, 1], [], []>} : vector<64x72xbf16>, vector<72x48xbf16>, vector<64x48xf32> -> vector<64x48xf32>
    %22 = arith.truncf %21 : vector<64x48xf32> to vector<64x48xbf16>
    %c0_34 = arith.constant 0 : index
    %c0_35 = arith.constant 0 : index
    %23 = vector.load %arg3[%c0_34, %c0_35] : memref<48x32xbf16, #tpu.memory_space<vmem>>, vector<48x32xbf16>
    %cst_36 = arith.constant dense<0.000000e+00> : vector<64x32xf32>
    %24 = tpu.matmul %22, %23, %cst_36 {dimension_numbers = #tpu.dot_dimension_numbers<[1], [0], [0], [1], [0, 0, 1, 1], [], []>} : vector<64x48xbf16>, vector<48x32xbf16>, vector<64x32xf32> -> vector<64x32xf32>
    %c0_37 = arith.constant 0 : index
    %c0_38 = arith.constant 0 : index
    %25 = vector.load %arg4[%c0_37, %c0_38] : memref<1x32xf32, #tpu.memory_space<vmem>>, vector<1x32xf32>
    %26 = vector.broadcast %25 : vector<1x32xf32> to vector<64x32xf32>
    %27 = arith.addf %24, %26 : vector<64x32xf32>
    %cst_39 = arith.constant 0.000000e+00 : f32
    %28 = vector.broadcast %cst_39 : f32 to vector<64x32xf32>
    %29 = arith.cmpf ogt, %27, %28 : vector<64x32xf32>
    %c0_40 = arith.constant 0 : index
    %c0_41 = arith.constant 0 : index
    %30 = vector.load %arg5[%c0_40, %c0_41] : memref<1x32xf32, #tpu.memory_space<vmem>>, vector<1x32xf32>
    %31 = vector.broadcast %30 : vector<1x32xf32> to vector<64x32xf32>
    %32 = arith.mulf %31, %27 : vector<64x32xf32>
    %33 = arith.select %29, %27, %32 : vector<64x32xi1>, vector<64x32xf32>
    %34 = vector.shape_cast %33 : vector<64x32xf32> to vector<8x256xf32>
    %35 = arith.truncf %34 : vector<8x256xf32> to vector<8x256xbf16>
    %c0_42 = arith.constant 0 : index
    %c0_43 = arith.constant 0 : index
    %c0_44 = arith.constant 0 : index
    %36 = vector.load %arg6[%c0_42, %c0_43, %c0_44] : memref<1x8x256xbf16, #tpu.memory_space<vmem>>, vector<1x8x256xbf16>
    %37 = vector.shape_cast %36 : vector<1x8x256xbf16> to vector<8x256xbf16>
    %38 = vector.shape_cast %35 : vector<8x256xbf16> to vector<1x8x256xbf16>
    tpu.vector_store %arg6[%c0_42, %c0_43, %c0_44], %38 {strides = array<i32>} : memref<1x8x256xbf16, #tpu.memory_space<vmem>>, vector<1x8x256xbf16>,
    return
  }
  func.func @transform_0(%arg0: i32) -> (i32, i32, i32, i32) {
    %c0_i32 = arith.constant 0 : i32
    %c0_i32_0 = arith.constant 0 : i32
    %c0_i32_1 = arith.constant 0 : i32
    %c0_i32_2 = arith.constant 0 : i32
    return %arg0, %c0_i32, %c0_i32_0, %c0_i32_1 : i32, i32, i32, i32
  }
  func.func @transform_1(%arg0: i32) -> (i32, i32) {
    %c0_i32 = arith.constant 0 : i32
    %c0_i32_0 = arith.constant 0 : i32
    %c0_i32_1 = arith.constant 0 : i32
    return %c0_i32, %c0_i32_0 : i32, i32
  }
  func.func @transform_2(%arg0: i32) -> (i32, i32) {
    %c0_i32 = arith.constant 0 : i32
    %c0_i32_0 = arith.constant 0 : i32
    %c0_i32_1 = arith.constant 0 : i32
    return %c0_i32, %c0_i32_0 : i32, i32
  }
  func.func @transform_3(%arg0: i32) -> (i32, i32) {
    %c0_i32 = arith.constant 0 : i32
    %c0_i32_0 = arith.constant 0 : i32
    %c0_i32_1 = arith.constant 0 : i32
    return %c0_i32, %c0_i32_0 : i32, i32
  }
  func.func @transform_4(%arg0: i32) -> (i32, i32) {
    %c0_i32 = arith.constant 0 : i32
    %c0_i32_0 = arith.constant 0 : i32
    %c0_i32_1 = arith.constant 0 : i32
    return %c0_i32, %c0_i32_0 : i32, i32
  }
  func.func @transform_5(%arg0: i32) -> (i32, i32, i32) {
    %c0_i32 = arith.constant 0 : i32
    %c0_i32_0 = arith.constant 0 : i32
    %c0_i32_1 = arith.constant 0 : i32
    return %arg0, %c0_i32, %c0_i32_0 : i32, i32, i32
  }
}

module attributes {stable_mosaic.version = 11 : i64} {
  func.func @_c_kernel(%arg0: i32, %arg1: memref<1x8x8x32xbf16, #tpu.memory_space<vmem>>, %arg2: memref<144x32xbf16, #tpu.memory_space<vmem>>, %arg3: memref<32x16xbf16, #tpu.memory_space<vmem>>, %arg4: memref<1x16xf32, #tpu.memory_space<vmem>>, %arg5: memref<1x16xf32, #tpu.memory_space<vmem>>, %arg6: memref<1x8x128xf32, #tpu.memory_space<vmem>>, %arg7: memref<10x10x16xbf16, #tpu.memory_space<vmem>>) attributes {dimension_semantics = [#tpu.dimension_semantics<parallel>], iteration_bounds = array<i64: 2>, scalar_prefetch = 0 : i64, scratch_operands = 1 : i64, tpu.core_type = #tpu.core_type<tc>, window_params = [{transform_indices = @transform_0, window_bounds = array<i64: 1, 8, 8, 32>}, {pipeline_mode = #tpu.pipeline_mode<synchronous>, transform_indices = @transform_1, window_bounds = array<i64: 144, 32>}, {pipeline_mode = #tpu.pipeline_mode<synchronous>, transform_indices = @transform_2, window_bounds = array<i64: 32, 16>}, {pipeline_mode = #tpu.pipeline_mode<synchronous>, transform_indices = @transform_3, window_bounds = array<i64: 1, 16>}, {pipeline_mode = #tpu.pipeline_mode<synchronous>, transform_indices = @transform_4, window_bounds = array<i64: 1, 16>}, {transform_indices = @transform_5, window_bounds = array<i64: 1, 8, 128>}]} {
    %c0 = arith.constant 0 : index
    %c0_0 = arith.constant 0 : index
    %c0_1 = arith.constant 0 : index
    %c0_2 = arith.constant 0 : index
    %0 = vector.load %arg1[%c0, %c0_0, %c0_1, %c0_2] : memref<1x8x8x32xbf16, #tpu.memory_space<vmem>>, vector<1x8x8x32xbf16>
    %1 = vector.shape_cast %0 : vector<1x8x8x32xbf16> to vector<8x8x32xbf16>
    %2 = vector.extract_strided_slice %1 {offsets = [0, 0, 0], sizes = [8, 8, 16], strides = [1, 1, 1]} : vector<8x8x32xbf16> to vector<8x8x16xbf16>
    %3 = vector.shape_cast %2 : vector<8x8x16xbf16> to vector<64x16xbf16>
    %cst = arith.constant 0.000000e+00 : bf16
    %4 = vector.broadcast %cst : bf16 to vector<10x10x16xbf16>
    %c0_3 = arith.constant 0 : index
    %c0_4 = arith.constant 0 : index
    %c0_5 = arith.constant 0 : index
    %5 = vector.load %arg7[%c0_3, %c0_4, %c0_5] : memref<10x10x16xbf16, #tpu.memory_space<vmem>>, vector<10x10x16xbf16>
    tpu.vector_store %arg7[%c0_3, %c0_4, %c0_5], %4 {strides = array<i32>} : memref<10x10x16xbf16, #tpu.memory_space<vmem>>, vector<10x10x16xbf16>,
    %6 = vector.extract_strided_slice %1 {offsets = [0, 0, 16], sizes = [8, 8, 16], strides = [1, 1, 1]} : vector<8x8x32xbf16> to vector<8x8x16xbf16>
    %c1 = arith.constant 1 : index
    %c1_6 = arith.constant 1 : index
    %c0_7 = arith.constant 0 : index
    %7 = vector.load %arg7[%c1, %c1_6, %c0_7] : memref<10x10x16xbf16, #tpu.memory_space<vmem>>, vector<8x8x16xbf16>
    tpu.vector_store %arg7[%c1, %c1_6, %c0_7], %6 {strides = array<i32>} : memref<10x10x16xbf16, #tpu.memory_space<vmem>>, vector<8x8x16xbf16>,
    %c0_8 = arith.constant 0 : index
    %c0_9 = arith.constant 0 : index
    %c0_10 = arith.constant 0 : index
    %8 = vector.load %arg7[%c0_8, %c0_9, %c0_10] : memref<10x10x16xbf16, #tpu.memory_space<vmem>>, vector<8x8x16xbf16>
    %c0_11 = arith.constant 0 : index
    %c1_12 = arith.constant 1 : index
    %c0_13 = arith.constant 0 : index
    %9 = vector.load %arg7[%c0_11, %c1_12, %c0_13] : memref<10x10x16xbf16, #tpu.memory_space<vmem>>, vector<8x8x16xbf16>
    %c0_14 = arith.constant 0 : index
    %c2 = arith.constant 2 : index
    %c0_15 = arith.constant 0 : index
    %10 = vector.load %arg7[%c0_14, %c2, %c0_15] : memref<10x10x16xbf16, #tpu.memory_space<vmem>>, vector<8x8x16xbf16>
    %c1_16 = arith.constant 1 : index
    %c0_17 = arith.constant 0 : index
    %c0_18 = arith.constant 0 : index
    %11 = vector.load %arg7[%c1_16, %c0_17, %c0_18] : memref<10x10x16xbf16, #tpu.memory_space<vmem>>, vector<8x8x16xbf16>
    %c1_19 = arith.constant 1 : index
    %c1_20 = arith.constant 1 : index
    %c0_21 = arith.constant 0 : index
    %12 = vector.load %arg7[%c1_19, %c1_20, %c0_21] : memref<10x10x16xbf16, #tpu.memory_space<vmem>>, vector<8x8x16xbf16>
    %c1_22 = arith.constant 1 : index
    %c2_23 = arith.constant 2 : index
    %c0_24 = arith.constant 0 : index
    %13 = vector.load %arg7[%c1_22, %c2_23, %c0_24] : memref<10x10x16xbf16, #tpu.memory_space<vmem>>, vector<8x8x16xbf16>
    %c2_25 = arith.constant 2 : index
    %c0_26 = arith.constant 0 : index
    %c0_27 = arith.constant 0 : index
    %14 = vector.load %arg7[%c2_25, %c0_26, %c0_27] : memref<10x10x16xbf16, #tpu.memory_space<vmem>>, vector<8x8x16xbf16>
    %c2_28 = arith.constant 2 : index
    %c1_29 = arith.constant 1 : index
    %c0_30 = arith.constant 0 : index
    %15 = vector.load %arg7[%c2_28, %c1_29, %c0_30] : memref<10x10x16xbf16, #tpu.memory_space<vmem>>, vector<8x8x16xbf16>
    %c2_31 = arith.constant 2 : index
    %c2_32 = arith.constant 2 : index
    %c0_33 = arith.constant 0 : index
    %16 = vector.load %arg7[%c2_31, %c2_32, %c0_33] : memref<10x10x16xbf16, #tpu.memory_space<vmem>>, vector<8x8x16xbf16>
    %17 = tpu.concatenate %8, %9, %10, %11, %12, %13, %14, %15, %16 in 2 : vector<8x8x16xbf16>, vector<8x8x16xbf16>, vector<8x8x16xbf16>, vector<8x8x16xbf16>, vector<8x8x16xbf16>, vector<8x8x16xbf16>, vector<8x8x16xbf16>, vector<8x8x16xbf16>, vector<8x8x16xbf16> -> vector<8x8x144xbf16>
    %18 = vector.shape_cast %17 : vector<8x8x144xbf16> to vector<64x144xbf16>
    %c0_34 = arith.constant 0 : index
    %c0_35 = arith.constant 0 : index
    %19 = vector.load %arg2[%c0_34, %c0_35] : memref<144x32xbf16, #tpu.memory_space<vmem>>, vector<144x32xbf16>
    %cst_36 = arith.constant dense<0.000000e+00> : vector<64x32xf32>
    %20 = tpu.matmul %18, %19, %cst_36 {dimension_numbers = #tpu.dot_dimension_numbers<[1], [0], [0], [1], [0, 0, 1, 1], [], []>} : vector<64x144xbf16>, vector<144x32xbf16>, vector<64x32xf32> -> vector<64x32xf32>
    %21 = arith.truncf %20 : vector<64x32xf32> to vector<64x32xbf16>
    %c0_37 = arith.constant 0 : index
    %c0_38 = arith.constant 0 : index
    %22 = vector.load %arg3[%c0_37, %c0_38] : memref<32x16xbf16, #tpu.memory_space<vmem>>, vector<32x16xbf16>
    %cst_39 = arith.constant dense<0.000000e+00> : vector<64x16xf32>
    %23 = tpu.matmul %21, %22, %cst_39 {dimension_numbers = #tpu.dot_dimension_numbers<[1], [0], [0], [1], [0, 0, 1, 1], [], []>} : vector<64x32xbf16>, vector<32x16xbf16>, vector<64x16xf32> -> vector<64x16xf32>
    %c0_40 = arith.constant 0 : index
    %c0_41 = arith.constant 0 : index
    %24 = vector.load %arg4[%c0_40, %c0_41] : memref<1x16xf32, #tpu.memory_space<vmem>>, vector<1x16xf32>
    %25 = vector.broadcast %24 : vector<1x16xf32> to vector<64x16xf32>
    %26 = arith.addf %23, %25 : vector<64x16xf32>
    %27 = arith.extf %3 : vector<64x16xbf16> to vector<64x16xf32>
    %28 = arith.addf %26, %27 : vector<64x16xf32>
    %cst_42 = arith.constant 0.000000e+00 : f32
    %29 = vector.broadcast %cst_42 : f32 to vector<64x16xf32>
    %30 = arith.cmpf ogt, %28, %29 : vector<64x16xf32>
    %c0_43 = arith.constant 0 : index
    %c0_44 = arith.constant 0 : index
    %31 = vector.load %arg5[%c0_43, %c0_44] : memref<1x16xf32, #tpu.memory_space<vmem>>, vector<1x16xf32>
    %32 = vector.broadcast %31 : vector<1x16xf32> to vector<64x16xf32>
    %33 = arith.mulf %32, %28 : vector<64x16xf32>
    %34 = arith.select %30, %28, %33 : vector<64x16xi1>, vector<64x16xf32>
    %35 = vector.shape_cast %34 : vector<64x16xf32> to vector<8x128xf32>
    %c0_45 = arith.constant 0 : index
    %c0_46 = arith.constant 0 : index
    %c0_47 = arith.constant 0 : index
    %36 = vector.load %arg6[%c0_45, %c0_46, %c0_47] : memref<1x8x128xf32, #tpu.memory_space<vmem>>, vector<1x8x128xf32>
    %37 = vector.shape_cast %36 : vector<1x8x128xf32> to vector<8x128xf32>
    %38 = vector.shape_cast %35 : vector<8x128xf32> to vector<1x8x128xf32>
    tpu.vector_store %arg6[%c0_45, %c0_46, %c0_47], %38 {strides = array<i32>} : memref<1x8x128xf32, #tpu.memory_space<vmem>>, vector<1x8x128xf32>,
    return
  }
  func.func @transform_0(%arg0: i32) -> (i32, i32, i32, i32) {
    %c0_i32 = arith.constant 0 : i32
    %c0_i32_0 = arith.constant 0 : i32
    %c0_i32_1 = arith.constant 0 : i32
    %c0_i32_2 = arith.constant 0 : i32
    return %arg0, %c0_i32, %c0_i32_0, %c0_i32_1 : i32, i32, i32, i32
  }
  func.func @transform_1(%arg0: i32) -> (i32, i32) {
    %c0_i32 = arith.constant 0 : i32
    %c0_i32_0 = arith.constant 0 : i32
    %c0_i32_1 = arith.constant 0 : i32
    return %c0_i32, %c0_i32_0 : i32, i32
  }
  func.func @transform_2(%arg0: i32) -> (i32, i32) {
    %c0_i32 = arith.constant 0 : i32
    %c0_i32_0 = arith.constant 0 : i32
    %c0_i32_1 = arith.constant 0 : i32
    return %c0_i32, %c0_i32_0 : i32, i32
  }
  func.func @transform_3(%arg0: i32) -> (i32, i32) {
    %c0_i32 = arith.constant 0 : i32
    %c0_i32_0 = arith.constant 0 : i32
    %c0_i32_1 = arith.constant 0 : i32
    return %c0_i32, %c0_i32_0 : i32, i32
  }
  func.func @transform_4(%arg0: i32) -> (i32, i32) {
    %c0_i32 = arith.constant 0 : i32
    %c0_i32_0 = arith.constant 0 : i32
    %c0_i32_1 = arith.constant 0 : i32
    return %c0_i32, %c0_i32_0 : i32, i32
  }
  func.func @transform_5(%arg0: i32) -> (i32, i32, i32) {
    %c0_i32 = arith.constant 0 : i32
    %c0_i32_0 = arith.constant 0 : i32
    %c0_i32_1 = arith.constant 0 : i32
    return %arg0, %c0_i32, %c0_i32_0 : i32, i32, i32
  }
}

module attributes {stable_mosaic.version = 11 : i64} {
  func.func @_c_kernel(%arg0: i32, %arg1: memref<1x8x8x32xbf16, #tpu.memory_space<vmem>>, %arg2: memref<144x32xbf16, #tpu.memory_space<vmem>>, %arg3: memref<32x16xbf16, #tpu.memory_space<vmem>>, %arg4: memref<1x16xf32, #tpu.memory_space<vmem>>, %arg5: memref<1x16xf32, #tpu.memory_space<vmem>>, %arg6: memref<1x64x16xf32, #tpu.memory_space<vmem>>, %arg7: memref<10x10x16xbf16, #tpu.memory_space<vmem>>) attributes {dimension_semantics = [#tpu.dimension_semantics<parallel>], iteration_bounds = array<i64: 2>, scalar_prefetch = 0 : i64, scratch_operands = 1 : i64, tpu.core_type = #tpu.core_type<tc>, window_params = [{transform_indices = @transform_0, window_bounds = array<i64: 1, 8, 8, 32>}, {pipeline_mode = #tpu.pipeline_mode<synchronous>, transform_indices = @transform_1, window_bounds = array<i64: 144, 32>}, {pipeline_mode = #tpu.pipeline_mode<synchronous>, transform_indices = @transform_2, window_bounds = array<i64: 32, 16>}, {pipeline_mode = #tpu.pipeline_mode<synchronous>, transform_indices = @transform_3, window_bounds = array<i64: 1, 16>}, {pipeline_mode = #tpu.pipeline_mode<synchronous>, transform_indices = @transform_4, window_bounds = array<i64: 1, 16>}, {transform_indices = @transform_5, window_bounds = array<i64: 1, 64, 16>}]} {
    %c0 = arith.constant 0 : index
    %c0_0 = arith.constant 0 : index
    %c0_1 = arith.constant 0 : index
    %c0_2 = arith.constant 0 : index
    %0 = vector.load %arg1[%c0, %c0_0, %c0_1, %c0_2] : memref<1x8x8x32xbf16, #tpu.memory_space<vmem>>, vector<1x8x8x32xbf16>
    %1 = vector.shape_cast %0 : vector<1x8x8x32xbf16> to vector<8x8x32xbf16>
    %2 = vector.extract_strided_slice %1 {offsets = [0, 0, 0], sizes = [8, 8, 16], strides = [1, 1, 1]} : vector<8x8x32xbf16> to vector<8x8x16xbf16>
    %3 = vector.shape_cast %2 : vector<8x8x16xbf16> to vector<64x16xbf16>
    %cst = arith.constant 0.000000e+00 : bf16
    %4 = vector.broadcast %cst : bf16 to vector<10x10x16xbf16>
    %c0_3 = arith.constant 0 : index
    %c0_4 = arith.constant 0 : index
    %c0_5 = arith.constant 0 : index
    %5 = vector.load %arg7[%c0_3, %c0_4, %c0_5] : memref<10x10x16xbf16, #tpu.memory_space<vmem>>, vector<10x10x16xbf16>
    tpu.vector_store %arg7[%c0_3, %c0_4, %c0_5], %4 {strides = array<i32>} : memref<10x10x16xbf16, #tpu.memory_space<vmem>>, vector<10x10x16xbf16>,
    %6 = vector.extract_strided_slice %1 {offsets = [0, 0, 16], sizes = [8, 8, 16], strides = [1, 1, 1]} : vector<8x8x32xbf16> to vector<8x8x16xbf16>
    %c1 = arith.constant 1 : index
    %c1_6 = arith.constant 1 : index
    %c0_7 = arith.constant 0 : index
    %7 = vector.load %arg7[%c1, %c1_6, %c0_7] : memref<10x10x16xbf16, #tpu.memory_space<vmem>>, vector<8x8x16xbf16>
    tpu.vector_store %arg7[%c1, %c1_6, %c0_7], %6 {strides = array<i32>} : memref<10x10x16xbf16, #tpu.memory_space<vmem>>, vector<8x8x16xbf16>,
    %c0_8 = arith.constant 0 : index
    %c0_9 = arith.constant 0 : index
    %c0_10 = arith.constant 0 : index
    %8 = vector.load %arg7[%c0_8, %c0_9, %c0_10] : memref<10x10x16xbf16, #tpu.memory_space<vmem>>, vector<8x8x16xbf16>
    %c0_11 = arith.constant 0 : index
    %c1_12 = arith.constant 1 : index
    %c0_13 = arith.constant 0 : index
    %9 = vector.load %arg7[%c0_11, %c1_12, %c0_13] : memref<10x10x16xbf16, #tpu.memory_space<vmem>>, vector<8x8x16xbf16>
    %c0_14 = arith.constant 0 : index
    %c2 = arith.constant 2 : index
    %c0_15 = arith.constant 0 : index
    %10 = vector.load %arg7[%c0_14, %c2, %c0_15] : memref<10x10x16xbf16, #tpu.memory_space<vmem>>, vector<8x8x16xbf16>
    %c1_16 = arith.constant 1 : index
    %c0_17 = arith.constant 0 : index
    %c0_18 = arith.constant 0 : index
    %11 = vector.load %arg7[%c1_16, %c0_17, %c0_18] : memref<10x10x16xbf16, #tpu.memory_space<vmem>>, vector<8x8x16xbf16>
    %c1_19 = arith.constant 1 : index
    %c1_20 = arith.constant 1 : index
    %c0_21 = arith.constant 0 : index
    %12 = vector.load %arg7[%c1_19, %c1_20, %c0_21] : memref<10x10x16xbf16, #tpu.memory_space<vmem>>, vector<8x8x16xbf16>
    %c1_22 = arith.constant 1 : index
    %c2_23 = arith.constant 2 : index
    %c0_24 = arith.constant 0 : index
    %13 = vector.load %arg7[%c1_22, %c2_23, %c0_24] : memref<10x10x16xbf16, #tpu.memory_space<vmem>>, vector<8x8x16xbf16>
    %c2_25 = arith.constant 2 : index
    %c0_26 = arith.constant 0 : index
    %c0_27 = arith.constant 0 : index
    %14 = vector.load %arg7[%c2_25, %c0_26, %c0_27] : memref<10x10x16xbf16, #tpu.memory_space<vmem>>, vector<8x8x16xbf16>
    %c2_28 = arith.constant 2 : index
    %c1_29 = arith.constant 1 : index
    %c0_30 = arith.constant 0 : index
    %15 = vector.load %arg7[%c2_28, %c1_29, %c0_30] : memref<10x10x16xbf16, #tpu.memory_space<vmem>>, vector<8x8x16xbf16>
    %c2_31 = arith.constant 2 : index
    %c2_32 = arith.constant 2 : index
    %c0_33 = arith.constant 0 : index
    %16 = vector.load %arg7[%c2_31, %c2_32, %c0_33] : memref<10x10x16xbf16, #tpu.memory_space<vmem>>, vector<8x8x16xbf16>
    %17 = tpu.concatenate %8, %9, %10, %11, %12, %13, %14, %15, %16 in 2 : vector<8x8x16xbf16>, vector<8x8x16xbf16>, vector<8x8x16xbf16>, vector<8x8x16xbf16>, vector<8x8x16xbf16>, vector<8x8x16xbf16>, vector<8x8x16xbf16>, vector<8x8x16xbf16>, vector<8x8x16xbf16> -> vector<8x8x144xbf16>
    %18 = vector.shape_cast %17 : vector<8x8x144xbf16> to vector<64x144xbf16>
    %c0_34 = arith.constant 0 : index
    %c0_35 = arith.constant 0 : index
    %19 = vector.load %arg2[%c0_34, %c0_35] : memref<144x32xbf16, #tpu.memory_space<vmem>>, vector<144x32xbf16>
    %cst_36 = arith.constant dense<0.000000e+00> : vector<64x32xf32>
    %20 = tpu.matmul %18, %19, %cst_36 {dimension_numbers = #tpu.dot_dimension_numbers<[1], [0], [0], [1], [0, 0, 1, 1], [], []>} : vector<64x144xbf16>, vector<144x32xbf16>, vector<64x32xf32> -> vector<64x32xf32>
    %21 = arith.truncf %20 : vector<64x32xf32> to vector<64x32xbf16>
    %c0_37 = arith.constant 0 : index
    %c0_38 = arith.constant 0 : index
    %22 = vector.load %arg3[%c0_37, %c0_38] : memref<32x16xbf16, #tpu.memory_space<vmem>>, vector<32x16xbf16>
    %cst_39 = arith.constant dense<0.000000e+00> : vector<64x16xf32>
    %23 = tpu.matmul %21, %22, %cst_39 {dimension_numbers = #tpu.dot_dimension_numbers<[1], [0], [0], [1], [0, 0, 1, 1], [], []>} : vector<64x32xbf16>, vector<32x16xbf16>, vector<64x16xf32> -> vector<64x16xf32>
    %c0_40 = arith.constant 0 : index
    %c0_41 = arith.constant 0 : index
    %24 = vector.load %arg4[%c0_40, %c0_41] : memref<1x16xf32, #tpu.memory_space<vmem>>, vector<1x16xf32>
    %25 = vector.broadcast %24 : vector<1x16xf32> to vector<64x16xf32>
    %26 = arith.addf %23, %25 : vector<64x16xf32>
    %27 = arith.extf %3 : vector<64x16xbf16> to vector<64x16xf32>
    %28 = arith.addf %26, %27 : vector<64x16xf32>
    %cst_42 = arith.constant 0.000000e+00 : f32
    %29 = vector.broadcast %cst_42 : f32 to vector<64x16xf32>
    %30 = arith.cmpf ogt, %28, %29 : vector<64x16xf32>
    %c0_43 = arith.constant 0 : index
    %c0_44 = arith.constant 0 : index
    %31 = vector.load %arg5[%c0_43, %c0_44] : memref<1x16xf32, #tpu.memory_space<vmem>>, vector<1x16xf32>
    %32 = vector.broadcast %31 : vector<1x16xf32> to vector<64x16xf32>
    %33 = arith.mulf %32, %28 : vector<64x16xf32>
    %34 = arith.select %30, %28, %33 : vector<64x16xi1>, vector<64x16xf32>
    %c0_45 = arith.constant 0 : index
    %c0_46 = arith.constant 0 : index
    %c0_47 = arith.constant 0 : index
    %35 = vector.load %arg6[%c0_45, %c0_46, %c0_47] : memref<1x64x16xf32, #tpu.memory_space<vmem>>, vector<1x64x16xf32>
    %36 = vector.shape_cast %35 : vector<1x64x16xf32> to vector<64x16xf32>
    %37 = vector.shape_cast %34 : vector<64x16xf32> to vector<1x64x16xf32>
    tpu.vector_store %arg6[%c0_45, %c0_46, %c0_47], %37 {strides = array<i32>} : memref<1x64x16xf32, #tpu.memory_space<vmem>>, vector<1x64x16xf32>,
    return
  }
  func.func @transform_0(%arg0: i32) -> (i32, i32, i32, i32) {
    %c0_i32 = arith.constant 0 : i32
    %c0_i32_0 = arith.constant 0 : i32
    %c0_i32_1 = arith.constant 0 : i32
    %c0_i32_2 = arith.constant 0 : i32
    return %arg0, %c0_i32, %c0_i32_0, %c0_i32_1 : i32, i32, i32, i32
  }
  func.func @transform_1(%arg0: i32) -> (i32, i32) {
    %c0_i32 = arith.constant 0 : i32
    %c0_i32_0 = arith.constant 0 : i32
    %c0_i32_1 = arith.constant 0 : i32
    return %c0_i32, %c0_i32_0 : i32, i32
  }
  func.func @transform_2(%arg0: i32) -> (i32, i32) {
    %c0_i32 = arith.constant 0 : i32
    %c0_i32_0 = arith.constant 0 : i32
    %c0_i32_1 = arith.constant 0 : i32
    return %c0_i32, %c0_i32_0 : i32, i32
  }
  func.func @transform_3(%arg0: i32) -> (i32, i32) {
    %c0_i32 = arith.constant 0 : i32
    %c0_i32_0 = arith.constant 0 : i32
    %c0_i32_1 = arith.constant 0 : i32
    return %c0_i32, %c0_i32_0 : i32, i32
  }
  func.func @transform_4(%arg0: i32) -> (i32, i32) {
    %c0_i32 = arith.constant 0 : i32
    %c0_i32_0 = arith.constant 0 : i32
    %c0_i32_1 = arith.constant 0 : i32
    return %c0_i32, %c0_i32_0 : i32, i32
  }
  func.func @transform_5(%arg0: i32) -> (i32, i32, i32) {
    %c0_i32 = arith.constant 0 : i32
    %c0_i32_0 = arith.constant 0 : i32
    %c0_i32_1 = arith.constant 0 : i32
    return %arg0, %c0_i32, %c0_i32_0 : i32, i32, i32
  }
}

module attributes {stable_mosaic.version = 11 : i64} {
  func.func @_ab_kernel(%arg0: i32, %arg1: memref<4x9x9x8xbf16, #tpu.memory_space<vmem>>, %arg2: memref<72x48xbf16, #tpu.memory_space<vmem>>, %arg3: memref<48x32xbf16, #tpu.memory_space<vmem>>, %arg4: memref<1x32xf32, #tpu.memory_space<vmem>>, %arg5: memref<1x32xf32, #tpu.memory_space<vmem>>, %arg6: memref<1x64x32xbf16, #tpu.memory_space<vmem>>) attributes {dimension_semantics = [#tpu.dimension_semantics<parallel>], iteration_bounds = array<i64: 2>, scalar_prefetch = 0 : i64, scratch_operands = 0 : i64, tpu.core_type = #tpu.core_type<tc>, window_params = [{transform_indices = @transform_0, window_bounds = array<i64: 4, 9, 9, 8>}, {pipeline_mode = #tpu.pipeline_mode<synchronous>, transform_indices = @transform_1, window_bounds = array<i64: 72, 48>}, {pipeline_mode = #tpu.pipeline_mode<synchronous>, transform_indices = @transform_2, window_bounds = array<i64: 48, 32>}, {pipeline_mode = #tpu.pipeline_mode<synchronous>, transform_indices = @transform_3, window_bounds = array<i64: 1, 32>}, {pipeline_mode = #tpu.pipeline_mode<synchronous>, transform_indices = @transform_4, window_bounds = array<i64: 1, 32>}, {transform_indices = @transform_5, window_bounds = array<i64: 1, 64, 32>}]} {
    %c0 = arith.constant 0 : index
    %c0_0 = arith.constant 0 : index
    %c0_1 = arith.constant 0 : index
    %c0_2 = arith.constant 0 : index
    %0 = vector.load %arg1[%c0, %c0_0, %c0_1, %c0_2] : memref<4x9x9x8xbf16, #tpu.memory_space<vmem>>, vector<1x8x8x8xbf16>
    %1 = vector.shape_cast %0 : vector<1x8x8x8xbf16> to vector<8x8x8xbf16>
    %c1 = arith.constant 1 : index
    %c0_3 = arith.constant 0 : index
    %c0_4 = arith.constant 0 : index
    %c0_5 = arith.constant 0 : index
    %2 = vector.load %arg1[%c1, %c0_3, %c0_4, %c0_5] : memref<4x9x9x8xbf16, #tpu.memory_space<vmem>>, vector<1x8x8x8xbf16>
    %3 = vector.shape_cast %2 : vector<1x8x8x8xbf16> to vector<8x8x8xbf16>
    %c0_6 = arith.constant 0 : index
    %c0_7 = arith.constant 0 : index
    %c1_8 = arith.constant 1 : index
    %c0_9 = arith.constant 0 : index
    %4 = vector.load %arg1[%c0_6, %c0_7, %c1_8, %c0_9] : memref<4x9x9x8xbf16, #tpu.memory_space<vmem>>, vector<1x8x8x8xbf16>
    %5 = vector.shape_cast %4 : vector<1x8x8x8xbf16> to vector<8x8x8xbf16>
    %c2 = arith.constant 2 : index
    %c0_10 = arith.constant 0 : index
    %c0_11 = arith.constant 0 : index
    %c0_12 = arith.constant 0 : index
    %6 = vector.load %arg1[%c2, %c0_10, %c0_11, %c0_12] : memref<4x9x9x8xbf16, #tpu.memory_space<vmem>>, vector<1x8x8x8xbf16>
    %7 = vector.shape_cast %6 : vector<1x8x8x8xbf16> to vector<8x8x8xbf16>
    %c3 = arith.constant 3 : index
    %c0_13 = arith.constant 0 : index
    %c0_14 = arith.constant 0 : index
    %c0_15 = arith.constant 0 : index
    %8 = vector.load %arg1[%c3, %c0_13, %c0_14, %c0_15] : memref<4x9x9x8xbf16, #tpu.memory_space<vmem>>, vector<1x8x8x8xbf16>
    %9 = vector.shape_cast %8 : vector<1x8x8x8xbf16> to vector<8x8x8xbf16>
    %c2_16 = arith.constant 2 : index
    %c0_17 = arith.constant 0 : index
    %c1_18 = arith.constant 1 : index
    %c0_19 = arith.constant 0 : index
    %10 = vector.load %arg1[%c2_16, %c0_17, %c1_18, %c0_19] : memref<4x9x9x8xbf16, #tpu.memory_space<vmem>>, vector<1x8x8x8xbf16>
    %11 = vector.shape_cast %10 : vector<1x8x8x8xbf16> to vector<8x8x8xbf16>
    %c0_20 = arith.constant 0 : index
    %c1_21 = arith.constant 1 : index
    %c0_22 = arith.constant 0 : index
    %c0_23 = arith.constant 0 : index
    %12 = vector.load %arg1[%c0_20, %c1_21, %c0_22, %c0_23] : memref<4x9x9x8xbf16, #tpu.memory_space<vmem>>, vector<1x8x8x8xbf16>
    %13 = vector.shape_cast %12 : vector<1x8x8x8xbf16> to vector<8x8x8xbf16>
    %c1_24 = arith.constant 1 : index
    %c1_25 = arith.constant 1 : index
    %c0_26 = arith.constant 0 : index
    %c0_27 = arith.constant 0 : index
    %14 = vector.load %arg1[%c1_24, %c1_25, %c0_26, %c0_27] : memref<4x9x9x8xbf16, #tpu.memory_space<vmem>>, vector<1x8x8x8xbf16>
    %15 = vector.shape_cast %14 : vector<1x8x8x8xbf16> to vector<8x8x8xbf16>
    %c0_28 = arith.constant 0 : index
    %c1_29 = arith.constant 1 : index
    %c1_30 = arith.constant 1 : index
    %c0_31 = arith.constant 0 : index
    %16 = vector.load %arg1[%c0_28, %c1_29, %c1_30, %c0_31] : memref<4x9x9x8xbf16, #tpu.memory_space<vmem>>, vector<1x8x8x8xbf16>
    %17 = vector.shape_cast %16 : vector<1x8x8x8xbf16> to vector<8x8x8xbf16>
    %18 = tpu.concatenate %1, %3, %5, %7, %9, %11, %13, %15, %17 in 2 : vector<8x8x8xbf16>, vector<8x8x8xbf16>, vector<8x8x8xbf16>, vector<8x8x8xbf16>, vector<8x8x8xbf16>, vector<8x8x8xbf16>, vector<8x8x8xbf16>, vector<8x8x8xbf16>, vector<8x8x8xbf16> -> vector<8x8x72xbf16>
    %19 = vector.shape_cast %18 : vector<8x8x72xbf16> to vector<64x72xbf16>
    %c0_32 = arith.constant 0 : index
    %c0_33 = arith.constant 0 : index
    %20 = vector.load %arg2[%c0_32, %c0_33] : memref<72x48xbf16, #tpu.memory_space<vmem>>, vector<72x48xbf16>
    %cst = arith.constant dense<0.000000e+00> : vector<64x48xf32>
    %21 = tpu.matmul %19, %20, %cst {dimension_numbers = #tpu.dot_dimension_numbers<[1], [0], [0], [1], [0, 0, 1, 1], [], []>} : vector<64x72xbf16>, vector<72x48xbf16>, vector<64x48xf32> -> vector<64x48xf32>
    %22 = arith.truncf %21 : vector<64x48xf32> to vector<64x48xbf16>
    %c0_34 = arith.constant 0 : index
    %c0_35 = arith.constant 0 : index
    %23 = vector.load %arg3[%c0_34, %c0_35] : memref<48x32xbf16, #tpu.memory_space<vmem>>, vector<48x32xbf16>
    %cst_36 = arith.constant dense<0.000000e+00> : vector<64x32xf32>
    %24 = tpu.matmul %22, %23, %cst_36 {dimension_numbers = #tpu.dot_dimension_numbers<[1], [0], [0], [1], [0, 0, 1, 1], [], []>} : vector<64x48xbf16>, vector<48x32xbf16>, vector<64x32xf32> -> vector<64x32xf32>
    %c0_37 = arith.constant 0 : index
    %c0_38 = arith.constant 0 : index
    %25 = vector.load %arg4[%c0_37, %c0_38] : memref<1x32xf32, #tpu.memory_space<vmem>>, vector<1x32xf32>
    %26 = vector.broadcast %25 : vector<1x32xf32> to vector<64x32xf32>
    %27 = arith.addf %24, %26 : vector<64x32xf32>
    %cst_39 = arith.constant 0.000000e+00 : f32
    %28 = vector.broadcast %cst_39 : f32 to vector<64x32xf32>
    %29 = arith.cmpf ogt, %27, %28 : vector<64x32xf32>
    %c0_40 = arith.constant 0 : index
    %c0_41 = arith.constant 0 : index
    %30 = vector.load %arg5[%c0_40, %c0_41] : memref<1x32xf32, #tpu.memory_space<vmem>>, vector<1x32xf32>
    %31 = vector.broadcast %30 : vector<1x32xf32> to vector<64x32xf32>
    %32 = arith.mulf %31, %27 : vector<64x32xf32>
    %33 = arith.select %29, %27, %32 : vector<64x32xi1>, vector<64x32xf32>
    %34 = arith.truncf %33 : vector<64x32xf32> to vector<64x32xbf16>
    %c0_42 = arith.constant 0 : index
    %c0_43 = arith.constant 0 : index
    %c0_44 = arith.constant 0 : index
    %35 = vector.load %arg6[%c0_42, %c0_43, %c0_44] : memref<1x64x32xbf16, #tpu.memory_space<vmem>>, vector<1x64x32xbf16>
    %36 = vector.shape_cast %35 : vector<1x64x32xbf16> to vector<64x32xbf16>
    %37 = vector.shape_cast %34 : vector<64x32xbf16> to vector<1x64x32xbf16>
    tpu.vector_store %arg6[%c0_42, %c0_43, %c0_44], %37 {strides = array<i32>} : memref<1x64x32xbf16, #tpu.memory_space<vmem>>, vector<1x64x32xbf16>,
    return
  }
  func.func @transform_0(%arg0: i32) -> (i32, i32, i32, i32) {
    %c0_i32 = arith.constant 0 : i32
    %c0_i32_0 = arith.constant 0 : i32
    %c0_i32_1 = arith.constant 0 : i32
    %c0_i32_2 = arith.constant 0 : i32
    return %arg0, %c0_i32, %c0_i32_0, %c0_i32_1 : i32, i32, i32, i32
  }
  func.func @transform_1(%arg0: i32) -> (i32, i32) {
    %c0_i32 = arith.constant 0 : i32
    %c0_i32_0 = arith.constant 0 : i32
    %c0_i32_1 = arith.constant 0 : i32
    return %c0_i32, %c0_i32_0 : i32, i32
  }
  func.func @transform_2(%arg0: i32) -> (i32, i32) {
    %c0_i32 = arith.constant 0 : i32
    %c0_i32_0 = arith.constant 0 : i32
    %c0_i32_1 = arith.constant 0 : i32
    return %c0_i32, %c0_i32_0 : i32, i32
  }
  func.func @transform_3(%arg0: i32) -> (i32, i32) {
    %c0_i32 = arith.constant 0 : i32
    %c0_i32_0 = arith.constant 0 : i32
    %c0_i32_1 = arith.constant 0 : i32
    return %c0_i32, %c0_i32_0 : i32, i32
  }
  func.func @transform_4(%arg0: i32) -> (i32, i32) {
    %c0_i32 = arith.constant 0 : i32
    %c0_i32_0 = arith.constant 0 : i32
    %c0_i32_1 = arith.constant 0 : i32
    return %c0_i32, %c0_i32_0 : i32, i32
  }
  func.func @transform_5(%arg0: i32) -> (i32, i32, i32) {
    %c0_i32 = arith.constant 0 : i32
    %c0_i32_0 = arith.constant 0 : i32
    %c0_i32_1 = arith.constant 0 : i32
    return %arg0, %c0_i32, %c0_i32_0 : i32, i32, i32
  }
}

</mosaic_0001>

<bundles_post_ra>
// kernel: downsample_block_forward.2
= control target key start
LH: loop header
LB: loop body
LE: loop exit
PB: predicated region body
PF: predicated region fallthrough
CT: control target
= control target key end

     0   :  { %s1687_s18 = smov 0   ;;  %s2002_s0 = inlined_call_operand.vmem [shape: bf16[8,9,9,8], index: 0, kind: input, shape index: {}]   ;;  %s2003_s1 = inlined_call_operand.vmem [shape: bf16[72,48], index: 1, kind: input, shape index: {}]   ;;  %s2004_s2 = inlined_call_operand.vmem [shape: bf16[48,32], index: 2, kind: input, shape index: {}]   ;;  %s2005_s3 = inlined_call_operand.vmem [shape: f32[1,32], index: 3, kind: input, shape index: {}]   ;;  %s2006_s4 = inlined_call_operand.vmem [shape: f32[1,32], index: 4, kind: input, shape index: {}]   ;;  %s2007_s5 = inlined_call_operand.vmem [shape: bf16[2,64,32], index: 5, kind: output, shape index: {}]  }
   0x1 LB: > { %s1693_s19 = sadd.s32 4294967295, %s1647_s18   ;;  %p1337_p0 = scmp.ge.s32.totalorder %s1647_s18, 1  ;;  %s1647_s18 = sphi %s1687_s18, %s15_s18  }
   0x2   : > { %p189_p1 = scmp.lt.s32.totalorder %s1647_s18, 3 }
   0x4   : > { %p190_p2 = pnand %p1337_p0, %p189_p1 }
   0x5   : > { %s1338_s20 = sshll.u32 (!%p190_p2), %s1693_s19, 2  ;;  %s1649_s25 = smov (!%p190_p2), 8  }
   0x6   : > { %193 = sbr.rel (%p190_p2) target bundleno = 667 (0x29b), region = 40  ;;  %p219_p3 = scmp.lt.s32.totalorder (!%p190_p2), %s1338_s20, 7 }
   0x7   : > { %s1650_s26 = smov (!%p190_p2), 24   ;;  %s1651_s27 = smov (!%p190_p2), 16  }
   0x8   : > { %s1652_s28 = smov (!%p190_p2), 32   ;;  %s1653_s29 = smov (!%p190_p2), 40  }
   0x9   : > { %s1654_s30 = smov (!%p190_p2), 48   ;;  %s1655_s12 = smov (!%p190_p2), 56  }
   0xa   : > { %s1656_s17 = smov (!%p190_p2), 64   ;;  %p225_p4 = scmp.lt.s32.totalorder (!%p190_p2), %s1693_s19, 1 }
   0xb   : > { %s2009_s20 = smov (!%p219_p3, %s1338_s20), 7  ;;  %vm1025_vm0 = vcmask 1043456   ;;  %vm812_vm1 = vcmask 64512   ;;  %vm837_vm2 = vcmask 130048   ;;  %vm854_vm3 = vcmask 195584  }
   0xc   : > { %s1552_s21 = smul.u32 72, %s2009_s20  ;;  %vm871_vm4 = vcmask 261120   ;;  %vm888_vm5 = vcmask 326656   ;;  %vm905_vm6 = vcmask 392192   ;;  %vm922_vm7 = vcmask 457728   ;;  %s2011_s19 = smov (!%p225_p4, %s1693_s19), 1 }
   0xd   : > { %vm939_vm8 = vcmask 523264   ;;  %vm1012_vm9 = vcmask 588800   ;;  %vm1269_vm11 = vcmask 257024  }
   0xe   : > { %s1701_s24 = scalar_lea.vmem %s2002_s0, %s1552_s21 }
   0xf   : > { %v1569_v0 = vld [vmem:[%s1701_s24 + $0x58] ss:$0 sps:$4 sm:$0xff]   ;;  %v1570_v1 = vld [vmem:[%s1701_s24 + $0x48] ss:$0 sps:$4 sm:$0xff]   ;;  %v1571_v2 = vld [vmem:[%s1701_s24 + $0x60] ss:$0 sps:$4 sm:$0xff]  }
  0x10   : > { %336 = vrot.lane.b32.xlu1 %v1569_v0, %s1649_s25  ;;  %332 = vrot.lane.b32.xlu0 %v1570_v1, %s1649_s25  ;;  %v1572_v3 = vld [vmem:[%s1701_s24 + $0x50] ss:$0 sps:$4 sm:$0xff]   ;;  %v1351_v4 = vld [vmem:[%s1701_s24 + $0x98] sm:$0xf] }
  0x11   : > { %v1350_v5 = vld [vmem:[%s1701_s24 + $0x90] sm:$0xf]  ;;  %v1712_v6 = vld [vmem:[%s1701_s24 + $0x8] sm:$0xf]  ;;  %v249_v7 = vld [vmem:[%s1701_s24 + $0xc] sm:$0x1]  ;;  %v1415_v13 = vcombine.low %v1351_v4, %v1351_v4 }
  0x12   : > { %v1716_v8 = vld [vmem:[%s1701_s24] sm:$0xf]  ;;  %v1407_v9 = vcombine.low %v1712_v6, %v249_v7  ;;  %v248_v10 = vld [vmem:[%s1701_s24 + $0x4] sm:$0x1]  ;;  %v1721_v11 = vld [vmem:[%s1701_s24 + $0x18] sm:$0xf]  ;;  %v1414_v18 = vcombine.low %v1350_v5, %v1350_v5 }
  0x13   : > { %v251_v12 = vld [vmem:[%s1701_s24 + $0x1c] sm:$0x1]  ;;  %v1406_v14 = vcombine.low %v1716_v8, %v248_v10  ;;  %v1728_v16 = vld [vmem:[%s1701_s24 + $0x10] sm:$0xf]  ;;  %v250_v17 = vld [vmem:[%s1701_s24 + $0x14] sm:$0x1] }
  0x14   : > { %338 = vrot.lane.b32.xlu1 %v1571_v2, %s1649_s25  ;;  %v1409_v15 = vcombine.low %v1721_v11, %v251_v12  ;;  %334 = vrot.lane.b32.xlu0 %v1572_v3, %s1649_s25  ;;  %v396_v19 = vshrl.u32 %v1407_v9, 16  ;;  %v398_v20 = vshll.u32 %v1407_v9, 16  ;;  %v1408_v21 = vcombine.low %v1728_v16, %v250_v17  ;;  %v1367_v35 = vld [vmem:[%s1701_s24 + $0x9c] sm:$0x1]  ;;  %v1353_v37 = vld [vmem:[%s1701_s24 + $0xa8] sm:$0xf] }
  0x15   : > { %v389_v22 = vshrl.u32 %v1406_v14, 16  ;;  %v391_v23 = vshll.u32 %v1406_v14, 16  ;;  %v1366_v38 = vld [vmem:[%s1701_s24 + $0x94] sm:$0x1]  ;;  %v1352_v39 = vld [vmem:[%s1701_s24 + $0xa0] sm:$0xf]  ;;  %v1431_v40 = vcombine.low %v1351_v4, %v1367_v35  ;;  %v1417_v41 = vcombine.low %v1353_v37, %v1353_v37 }
  0x16   : > { %v412_v24 = vshll.u32 %v1409_v15, 16  ;;  %v400_v25 = vrot.slane %v398_v20, 1  ;;  %v405_v26 = vshll.u32 %v1408_v21, 16  ;;  %v410_v28 = vshrl.u32 %v1409_v15, 16  ;;  %v1369_v43 = vld [vmem:[%s1701_s24 + $0xac] sm:$0x1] }
  0x17   : > { %v393_v27 = vrot.slane %v391_v23, 1  ;;  %v403_v31 = vshrl.u32 %v1408_v21, 16  ;;  %v1430_v42 = vcombine.low %v1350_v5, %v1366_v38  ;;  %v1416_v44 = vcombine.low %v1352_v39, %v1352_v39  ;;  %v1368_v45 = vld [vmem:[%s1701_s24 + $0xa4] sm:$0x1]  ;;  %v1585_v47 = vld [vmem:[%s1701_s24 + $0xe0] ss:$0 sps:$4 sm:$0xff]  }
  0x18   : > { %486 = vrot.lane.b32.xlu1 %v1415_v13, %s1650_s26  ;;  %v414_v29 = vrot.slane %v412_v24, 1  ;;  %484 = vrot.lane.b32.xlu0 %v1414_v18, %s1650_s26  ;;  %v401_v30 = vor.u32 %v400_v25, %v396_v19  ;;  %v407_v32 = vrot.slane %v405_v26, 1  ;;  %v1433_v46 = vcombine.low %v1353_v37, %v1369_v43  ;;  %v1586_v50 = vld [vmem:[%s1701_s24 + $0xd8] ss:$0 sps:$4 sm:$0xff]   ;;  %v1587_v52 = vld [vmem:[%s1701_s24 + $0xf0] ss:$0 sps:$4 sm:$0xff]  }
  0x19   : > { %v394_v33 = vor.u32 %v393_v27, %v389_v22  ;;  %v574_v48 = vshll.u32 %v1431_v40, 16  ;;  %v1432_v49 = vcombine.low %v1352_v39, %v1368_v45  ;;  %v567_v51 = vshll.u32 %v1430_v42, 16  ;;  %v1588_v56 = vld [vmem:[%s1701_s24 + $0xe8] ss:$0 sps:$4 sm:$0xff]   ;;  %v1375_v4 = vld [vmem:[%s1701_s24 + $0x10] sm:$0xf] }
  0x1a   : > { %v415_v34 = vor.u32 %v414_v29, %v410_v28  ;;  %v408_v36 = vor.u32 %v407_v32, %v403_v31  ;;  %v572_v53 = vshrl.u32 %v1431_v40, 16  ;;  %v588_v55 = vshll.u32 %v1433_v46, 16  ;;  %v1374_v5 = vld [vmem:[%s1701_s24 + $0x8] sm:$0xf]  ;;  %v1391_v9 = vld [vmem:[%s1701_s24 + $0x14] sm:$0x1] }
  0x1b   : > { %v576_v54 = vrot.slane %v574_v48, 1  ;;  %v565_v57 = vshrl.u32 %v1430_v42, 16  ;;  %v569_v58 = vrot.slane %v567_v51, 1  ;;  %v581_v59 = vshll.u32 %v1432_v49, 16  ;;  %v1377_v12 = vld [vmem:[%s1701_s24 + $0x20] sm:$0xf] }
  0x1c   : > { %446 = vrot.lane.b32.xlu1 %v401_v30, %s1651_s27  ;;  %444 = vrot.lane.b32.xlu0 %v394_v33, %s1651_s27  ;;  %v586_v61 = vshrl.u32 %v1433_v46, 16  ;;  %v590_v62 = vrot.slane %v588_v55, 1  ;;  %v579_v0 = vshrl.u32 %v1432_v49, 16  ;;  %v1439_v7 = vcombine.low %v1375_v4, %v1375_v4  ;;  %v1390_v13 = vld [vmem:[%s1701_s24 + $0xc] sm:$0x1]  ;;  %v1634_v21 = vld [vmem:[%s2003_s1 + $0x18] sm:$0xff]  }
  0x1d   : > { %v577_v60 = vor.u32 %v576_v54, %v572_v53  ;;  %v570_v63 = vor.u32 %v569_v58, %v565_v57  ;;  %v583_v1 = vrot.slane %v581_v59, 1  ;;  %v1438_v10 = vcombine.low %v1374_v5, %v1374_v5  ;;  %v1376_v14 = vld [vmem:[%s1701_s24 + $0x18] sm:$0xf]  ;;  %v1633_v20 = vld [vmem:[%s2003_s1 + $0x20] ss:$0 sps:$4 sm:$0xff]   ;;  %v1635_v29 = vld [vmem:[%s2003_s1 + $0x10] sm:$0xff]  }
  0x1e   : > { %v591_v2 = vor.u32 %v590_v62, %v586_v61  ;;  %v1455_v15 = vcombine.low %v1375_v4, %v1391_v9  ;;  %v1441_v17 = vcombine.low %v1377_v12, %v1377_v12  ;;  %v1454_v18 = vcombine.low %v1374_v5, %v1390_v13  ;;  %v1597_v22 = vld [vmem:[%s1701_s24 + $0x58] ss:$0 sps:$4 sm:$0xff]   ;;  %v1393_v24 = vld [vmem:[%s1701_s24 + $0x24] sm:$0x1]  ;;  %v1598_v25 = vld [vmem:[%s1701_s24 + $0x50] ss:$0 sps:$4 sm:$0xff]   ;;  %1551 = vmatprep.subr.msk.bf16.mxu0 %vm1025_vm0, %v1633_v20 }
  0x1f   : > { %v584_v3 = vor.u32 %v583_v1, %v579_v0  ;;  %v1440_v19 = vcombine.low %v1376_v14, %v1376_v14  ;;  %v1027_v27 = vsel %vm1025_vm0, %v1633_v20, 0  ;;  %v1392_v28 = vld [vmem:[%s1701_s24 + $0x1c] sm:$0x1]  ;;  %v1457_v30 = vcombine.low %v1377_v12, %v1393_v24  ;;  %v1599_v31 = vld [vmem:[%s1701_s24 + $0x68] ss:$0 sps:$4 sm:$0xff]  }
  0x20   : > { %450 = vrot.lane.b32.xlu1 %v415_v34, %s1651_s27  ;;  %448 = vrot.lane.b32.xlu0 %v408_v36, %s1651_s27  ;;  %v750_v23 = vshll.u32 %v1455_v15, 16  ;;  %v743_v26 = vshll.u32 %v1454_v18, 16  ;;  %v748_v32 = vshrl.u32 %v1455_v15, 16  ;;  %v1456_v34 = vcombine.low %v1376_v14, %v1392_v28  ;;  %v1600_v35 = vld [vmem:[%s1701_s24 + $0x60] ss:$0 sps:$4 sm:$0xff]   ;;  %v1636_v38 = vld [vmem:[%s2003_s1 + $0x8] sm:$0xff]  }
  0x21   : > { %1520 = vmatpush3.bf16.msra.mxu0 %v1027_v27  ;;  %v741_v36 = vshrl.u32 %v1454_v18, 16  ;;  %v764_v40 = vshll.u32 %v1457_v30, 16  ;;  %v1792_v43 = vld [vmem:[%s1701_s24 + $0x28] sm:$0xf]  ;;  %v1796_v45 = vld [vmem:[%s1701_s24 + $0x20] sm:$0xf] }
  0x22   : > { %1521 = vmatprep.subr.bf16.mxu0 %v1634_v21  ;;  %v752_v33 = vrot.slane %v750_v23, 1  ;;  %v745_v37 = vrot.slane %v743_v26, 1  ;;  %v757_v42 = vshll.u32 %v1456_v34, 16  ;;  %v252_v46 = vld [vmem:[%s1701_s24 + $0x24] sm:$0x1]  ;;  %v755_v53 = vshrl.u32 %v1456_v34, 16 }
  0x23   : > { %v1601_v48 = vld [vmem:[%s1701_s24 + $0x70] ss:$0 sps:$4 sm:$0xff]   ;;  %v1602_v49 = vld [vmem:[%s1701_s24 + $0x68] ss:$0 sps:$4 sm:$0xff]   ;;  %v766_v51 = vrot.slane %v764_v40, 1  ;;  %v1410_v55 = vcombine.low %v1796_v45, %v252_v46 }
  0x24   : > { %490 = vrot.lane.b32.xlu1 %v1417_v41, %s1650_s26  ;;  %488 = vrot.lane.b32.xlu0 %v1416_v44, %s1650_s26  ;;  %v753_v39 = vor.u32 %v752_v33, %v748_v32  ;;  %v746_v41 = vor.u32 %v745_v37, %v741_v36  ;;  %v253_v44 = vld [vmem:[%s1701_s24 + $0x2c] sm:$0x1]  ;;  %v759_v54 = vrot.slane %v757_v42, 1  ;;  %v255_v57 = vld [vmem:[%s1701_s24 + $0x3c] sm:$0x1] }
  0x25   : > { %1522 = vmatpush3.bf16.msra.mxu0 %v1634_v21  ;;  %v1813_v58 = vld [vmem:[%s1701_s24 + $0x30] sm:$0xf]  ;;  %v254_v59 = vld [vmem:[%s1701_s24 + $0x34] sm:$0x1]  ;;  %v419_v0 = vshll.u32 %v1410_v55, 16  ;;  %v417_v9 = vshrl.u32 %v1410_v55, 16 }
  0x26   : > { %1523 = vmatprep.subr.bf16.mxu0 %v1635_v29  ;;  %v1412_v1 = vcombine.low %v1813_v58, %v254_v59  ;;  %v1354_v23 = vld [vmem:[%s1701_s24 + $0xb0] sm:$0xf]  ;;  %v1357_v27 = vld [vmem:[%s1701_s24 + $0xc8] sm:$0xf]  ;;  %v1370_v28 = vld [vmem:[%s1701_s24 + $0xb4] sm:$0x1] }
  0x27   : > { %v1418_v26 = vcombine.low %v1354_v23, %v1354_v23  ;;  %v1434_v32 = vcombine.low %v1354_v23, %v1370_v28  ;;  %v1373_v33 = vld [vmem:[%s1701_s24 + $0xcc] sm:$0x1]  ;;  %v1617_v37 = vld [vmem:[%s1701_s24 + $0x100] ss:$0 sps:$4 sm:$0xff]   ;;  %v1618_v40 = vld [vmem:[%s1701_s24 + $0xf8] ss:$0 sps:$4 sm:$0xff]  }
  0x28   : > { %526 = vrot.lane.b32.xlu1 %v1585_v47, %s1652_s28  ;;  %524 = vrot.lane.b32.xlu0 %v1586_v50, %s1652_s28  ;;  %v1637_v47 = vld [vmem:[%s2003_s1] sm:$0xff]   ;;  %v762_v50 = vshrl.u32 %v1457_v30, 16  ;;  %v433_v12 = vshll.u32 %v1412_v1, 16  ;;  %v431_v18 = vshrl.u32 %v1412_v1, 16  ;;  %v1437_v36 = vcombine.low %v1357_v27, %v1373_v33  ;;  %v1619_v42 = vld [vmem:[%s1701_s24 + $0x110] ss:$0 sps:$4 sm:$0xff]  }
  0x29   : > { %1524 = vmatpush3.bf16.msra.mxu0 %v1635_v29  ;;  %v1356_v29 = vld [vmem:[%s1701_s24 + $0xc0] sm:$0xf]  ;;  %v1395_v1 = vld [vmem:[%s1701_s24 + $0x34] sm:$0x1] }
  0x2a   : > { %1525 = vmatprep.subr.bf16.mxu0 %v1636_v38  ;;  %v1420_v34 = vcombine.low %v1356_v29, %v1356_v29 }
  0x2c   : > { %530 = vrot.lane.b32.xlu1 %v1587_v52, %s1652_s28  ;;  %528 = vrot.lane.b32.xlu0 %v1588_v56, %s1652_s28  ;;  %v1411_v52 = vcombine.low %v1792_v43, %v253_v44  ;;  %v1809_v56 = vld [vmem:[%s1701_s24 + $0x38] sm:$0xf] }
  0x2d   : > { %1526 = vmatpush3.bf16.msra.mxu0 %v1636_v38  ;;  %v1413_v62 = vcombine.low %v1809_v56, %v255_v57 }
  0x2e   : > { %1527 = vmatprep.subr.bf16.mxu0 %v1637_v47  ;;  %v426_v61 = vshll.u32 %v1411_v52, 16 }
  0x2f   : > { %v440_v5 = vshll.u32 %v1413_v62, 16  ;;  %v438_v14 = vshrl.u32 %v1413_v62, 16  ;;  %v1379_v62 = vld [vmem:[%s1701_s24 + $0x30] sm:$0xf] }
  0x30   : > { %622 = vrot.lane.b32.xlu1 %v577_v60, %s1653_s29  ;;  %620 = vrot.lane.b32.xlu0 %v570_v63, %s1653_s29  ;;  %v767_v60 = vor.u32 %v766_v51, %v762_v50  ;;  %v760_v63 = vor.u32 %v759_v54, %v755_v53  ;;  %v428_v4 = vrot.slane %v426_v61, 1  ;;  %v614_v53 = vshrl.u32 %v1437_v36, 16 }
  0x31   : > { %1528 = vmatpush3.bf16.msra.mxu0 %v1637_v47  ;;  %v442_v15 = vrot.slane %v440_v5, 1  ;;  %v616_v47 = vshll.u32 %v1437_v36, 16  ;;  %v1380_v5 = vld [vmem:[%s1701_s24 + $0x38] sm:$0xf] }
  0x33   : > { %v443_v20 = vor.u32 %v442_v15, %v438_v14  ;;  %v618_v54 = vrot.slane %v616_v47, 1  ;;  %v1396_v14 = vld [vmem:[%s1701_s24 + $0x3c] sm:$0x1] }
  0x34   : > { %626 = vrot.lane.b32.xlu1 %v591_v2, %s1653_s29  ;;  %624 = vrot.lane.b32.xlu0 %v584_v3, %s1653_s29  ;;  %v1603_v2 = vld [vmem:[%s1701_s24 + $0x80] ss:$0 sps:$4 sm:$0xff]   ;;  %v424_v3 = vshrl.u32 %v1411_v52, 16 }
  0x36   : > { %v429_v13 = vor.u32 %v428_v4, %v424_v3  ;;  %v1381_v3 = vld [vmem:[%s1701_s24 + $0x40] sm:$0xf]  ;;  %v1394_v4 = vld [vmem:[%s1701_s24 + $0x2c] sm:$0x1] }
  0x38   : > { %662 = vrot.lane.b32.xlu1 %v1439_v7, %s1654_s30  ;;  %660 = vrot.lane.b32.xlu0 %v1438_v10, %s1654_s30  ;;  %v1604_v7 = vld [vmem:[%s1701_s24 + $0x78] ss:$0 sps:$4 sm:$0xff]   ;;  %v421_v10 = vrot.slane %v419_v0, 1  ;;  %v1443_v0 = vcombine.low %v1379_v62, %v1379_v62 }
  0x3c   : > { %666 = vrot.lane.b32.xlu1 %v1441_v17, %s1654_s30  ;;  %664 = vrot.lane.b32.xlu0 %v1440_v19, %s1654_s30  ;;  %v422_v17 = vor.u32 %v421_v10, %v417_v9  ;;  %v435_v19 = vrot.slane %v433_v12, 1  ;;  %v1445_v9 = vcombine.low %v1381_v3, %v1381_v3  ;;  %v1397_v12 = vld [vmem:[%s1701_s24 + $0x44] sm:$0x1] }
  0x3d   : > { %v1461_v15 = vcombine.low %v1381_v3, %v1397_v12 }
  0x3e   : > { %v436_v21 = vor.u32 %v435_v19, %v431_v18  ;;  %v1460_v19 = vcombine.low %v1380_v5, %v1396_v14 }
  0x40   : > { %702 = vrot.lane.b32.xlu1 %v1597_v22, %s1655_s12  ;;  %700 = vrot.lane.b32.xlu0 %v1598_v25, %s1655_s12  ;;  %v1355_v22 = vld [vmem:[%s1701_s24 + $0xb8] sm:$0xf]  ;;  %v1371_v25 = vld [vmem:[%s1701_s24 + $0xbc] sm:$0x1] }
  0x41   : > { %v1419_v24 = vcombine.low %v1355_v22, %v1355_v22  ;;  %v1435_v30 = vcombine.low %v1355_v22, %v1371_v25  ;;  %v1631_v22 = vld [vmem:[%s1701_s24 + $0x88] ss:$0 sps:$4 sm:$0xff]   ;;  %v792_v25 = vshll.u32 %v1461_v15, 16 }
  0x43   : > { %v602_v38 = vshll.u32 %v1435_v30, 16  ;;  %v600_v44 = vshrl.u32 %v1435_v30, 16 }
  0x44   : > { %706 = vrot.lane.b32.xlu1 %v1599_v31, %s1655_s12  ;;  %704 = vrot.lane.b32.xlu0 %v1600_v35, %s1655_s12  ;;  %v1421_v31 = vcombine.low %v1357_v27, %v1357_v27  ;;  %v1372_v35 = vld [vmem:[%s1701_s24 + $0xc4] sm:$0x1] }
  0x45   : > { %v604_v46 = vrot.slane %v602_v38, 1 }
  0x47   : > { %v605_v52 = vor.u32 %v604_v46, %v600_v44 }
  0x48   : > { %798 = vrot.lane.b32.xlu1 %v753_v39, %s1656_s17  ;;  %796 = vrot.lane.b32.xlu0 %v746_v41, %s1656_s17  ;;  %v1436_v39 = vcombine.low %v1356_v29, %v1372_v35  ;;  %v595_v41 = vshll.u32 %v1434_v32, 16  ;;  %v785_v29 = vshll.u32 %v1460_v19, 16  ;;  %v794_v35 = vrot.slane %v792_v25, 1 }
  0x4a   : > { %v597_v50 = vrot.slane %v595_v41, 1  ;;  %v609_v51 = vshll.u32 %v1436_v39, 16  ;;  %v607_v57 = vshrl.u32 %v1436_v39, 16  ;;  %v787_v38 = vrot.slane %v785_v29, 1 }
  0x4c   : > { %342 = vrot.lane.b32.xlu1 %v1601_v48, %s1649_s25  ;;  %340 = vrot.lane.b32.xlu0 %v1602_v49, %s1649_s25  ;;  %v1620_v48 = vld [vmem:[%s1701_s24 + $0x108] ss:$0 sps:$4 sm:$0xff]   ;;  %v593_v49 = vshrl.u32 %v1434_v32, 16  ;;  %v611_v59 = vrot.slane %v609_v51, 1  ;;  %v1638_v32 = vld [vmem:[%s2004_s2 + $0x10] sm:$0xff]  }
  0x4d   : > { %1537 = vmatprep.subr.bf16.mxu1 %v1638_v32 }
  0x4e   : > { %v598_v55 = vor.u32 %v597_v50, %v593_v49  ;;  %v612_v61 = vor.u32 %v611_v59, %v607_v57  ;;  %1538 = vmatpush3.bf16.msra.mxu1 %v1638_v32 }
  0x50   : > { %802 = vrot.lane.b32.xlu1 %v767_v60, %s1656_s17  ;;  %800 = vrot.lane.b32.xlu0 %v760_v63, %s1656_s17  ;;  %v619_v60 = vor.u32 %v618_v54, %v614_v53  ;;  %v1378_v63 = vld [vmem:[%s1701_s24 + $0x28] sm:$0xf] }
  0x51   : > { %v1458_v10 = vcombine.low %v1378_v63, %v1394_v4 }
  0x53   : > { %v769_v27 = vshrl.u32 %v1458_v10, 16 }
  0x54   : > { %346 = vrot.lane.b32.xlu1 %v1603_v2, %s1649_s25  ;;  %344 = vrot.lane.b32.xlu0 %v1604_v7, %s1649_s25  ;;  %v1442_v2 = vcombine.low %v1378_v63, %v1378_v63  ;;  %v1459_v7 = vcombine.low %v1379_v62, %v1395_v1 }
  0x56   : > { %v778_v18 = vshll.u32 %v1459_v7, 16  ;;  %v776_v23 = vshrl.u32 %v1459_v7, 16 }
  0x58   : > { %454 = vrot.lane.b32.xlu1 %v429_v13, %s1651_s27  ;;  %452 = vrot.lane.b32.xlu0 %v422_v17, %s1651_s27  ;;  %v1444_v13 = vcombine.low %v1380_v5, %v1380_v5  ;;  %v1629_v17 = vld [vmem:[%s1701_s24 + $0x78] ss:$0 sps:$4 sm:$0xff]  }
  0x5c   : > { %458 = vrot.lane.b32.xlu1 %v443_v20, %s1651_s27  ;;  %456 = vrot.lane.b32.xlu0 %v436_v21, %s1651_s27  ;;  %v1630_v20 = vld [vmem:[%s1701_s24 + $0x70] ss:$0 sps:$4 sm:$0xff]   ;;  %v771_v21 = vshll.u32 %v1458_v10, 16 }
  0x5e   : > { %v773_v28 = vrot.slane %v771_v21, 1 }
  0x60   : > { %494 = vrot.lane.b32.xlu1 %v1419_v24, %s1650_s26  ;;  %492 = vrot.lane.b32.xlu0 %v1418_v26, %s1650_s26  ;;  %v780_v24 = vrot.slane %v778_v18, 1  ;;  %v1632_v26 = vld [vmem:[%s1701_s24 + $0x80] ss:$0 sps:$4 sm:$0xff]   ;;  %v774_v36 = vor.u32 %v773_v28, %v769_v27 }
  0x62   : > { %v781_v33 = vor.u32 %v780_v24, %v776_v23 }
  0x64   : > { %498 = vrot.lane.b32.xlu1 %v1421_v31, %s1650_s26  ;;  %496 = vrot.lane.b32.xlu0 %v1420_v34, %s1650_s26  ;;  %v790_v34 = vshrl.u32 %v1461_v15, 16 }
  0x66   : > { %v795_v41 = vor.u32 %v794_v35, %v790_v34 }
  0x68   : > { %534 = vrot.lane.b32.xlu1 %v1617_v37, %s1652_s28  ;;  %532 = vrot.lane.b32.xlu0 %v1618_v40, %s1652_s28  ;;  %v783_v37 = vshrl.u32 %v1460_v19, 16 }
  0x6c   : > { %538 = vrot.lane.b32.xlu1 %v1619_v42, %s1652_s28  ;;  %536 = vrot.lane.b32.xlu0 %v1620_v48, %s1652_s28  ;;  %v788_v42 = vor.u32 %v787_v38, %v783_v37 }
  0x70   : > { %630 = vrot.lane.b32.xlu1 %v605_v52, %s1653_s29  ;;  %628 = vrot.lane.b32.xlu0 %v598_v55, %s1653_s29 }
  0x74   : > { %634 = vrot.lane.b32.xlu1 %v619_v60, %s1653_s29  ;;  %632 = vrot.lane.b32.xlu0 %v612_v61, %s1653_s29 }
  0x78   : > { %670 = vrot.lane.b32.xlu1 %v1443_v0, %s1654_s30  ;;  %668 = vrot.lane.b32.xlu0 %v1442_v2, %s1654_s30 }
  0x7c   : > { %674 = vrot.lane.b32.xlu1 %v1445_v9, %s1654_s30  ;;  %672 = vrot.lane.b32.xlu0 %v1444_v13, %s1654_s30  ;;  %s1494_s30 = sshll.u32 %s2011_s19, 5 }
  0x7d   : > { %s1981_s8 = scalar_lea.vmem %s2007_s5, %s1494_s30 }
  0x80   : > { %710 = vrot.lane.b32.xlu1 %v1629_v17, %s1655_s12  ;;  %708 = vrot.lane.b32.xlu0 %v1630_v20, %s1655_s12 }
  0x82   : > { %v1872_v30 = vpop.permute.xlu1 %336  ;;  %v333_v31 = vpop.permute.xlu0 %332 }
  0x83   : > { %v815_v5 = vsel %vm812_vm1, %v1716_v8, %v333_v31  ;;  %v821_v28 = vsel %vm812_vm1, %v1728_v16, %v1872_v30 }
  0x84   : > { %714 = vrot.lane.b32.xlu1 %v1631_v22, %s1655_s12  ;;  %712 = vrot.lane.b32.xlu0 %v1632_v26, %s1655_s12 }
  0x86   : > { %v339_v39 = vpop.permute.xlu1 %338  ;;  %v335_v40 = vpop.permute.xlu0 %334 }
  0x87   : > { %v818_v3 = vsel %vm812_vm1, %v1712_v6, %v335_v40  ;;  %v824_v26 = vsel %vm812_vm1, %v1721_v11, %v339_v39 }
  0x88   : > { %806 = vrot.lane.b32.xlu1 %v781_v33, %s1656_s17  ;;  %804 = vrot.lane.b32.xlu0 %v774_v36, %s1656_s17 }
  0x8a   : > { %v487_v44 = vpop.permute.xlu1 %486  ;;  %v485_v46 = vpop.permute.xlu0 %484 }
  0x8c   : > { %810 = vrot.lane.b32.xlu1 %v795_v41, %s1656_s17  ;;  %808 = vrot.lane.b32.xlu0 %v788_v42, %s1656_s17 }
  0x8e   : > { %v447_v47 = vpop.permute.xlu1 %446  ;;  %v445_v48 = vpop.permute.xlu0 %444 }
  0x8f   : > { %v841_v7 = vsel %vm837_vm2, %v818_v3, %v447_v47  ;;  %v839_v10 = vsel %vm837_vm2, %v815_v5, %v445_v48 }
  0x90   : > { %v858_v12 = vsel %vm854_vm3, %v841_v7, %v487_v44  ;;  %v856_v6 = vsel %vm854_vm3, %v839_v10, %v485_v46 }
  0x92   : > { %v451_v49 = vpop.permute.xlu1 %450  ;;  %v449_v50 = vpop.permute.xlu0 %448 }
  0x93   : > { %v845_v29 = vsel %vm837_vm2, %v824_v26, %v451_v49  ;;  %v843_v32 = vsel %vm837_vm2, %v821_v28, %v449_v50 }
  0x96   : > { %v491_v51 = vpop.permute.xlu1 %490  ;;  %v489_v52 = vpop.permute.xlu0 %488 }
  0x97   : > { %v862_v33 = vsel %vm854_vm3, %v845_v29, %v491_v51  ;;  %v860_v35 = vsel %vm854_vm3, %v843_v32, %v489_v52 }
  0x9a   : > { %v527_v53 = vpop.permute.xlu1 %526  ;;  %v525_v54 = vpop.permute.xlu0 %524 }
  0x9b   : > { %v875_v14 = vsel %vm871_vm4, %v858_v12, %v527_v53  ;;  %v873_v8 = vsel %vm871_vm4, %v856_v6, %v525_v54 }
  0x9e   : > { %v531_v55 = vpop.permute.xlu1 %530  ;;  %v529_v57 = vpop.permute.xlu0 %528 }
  0x9f   : > { %v879_v36 = vsel %vm871_vm4, %v862_v33, %v531_v55  ;;  %v877_v37 = vsel %vm871_vm4, %v860_v35, %v529_v57 }
  0xa2   : > { %v623_v59 = vpop.permute.xlu1 %622  ;;  %v621_v60 = vpop.permute.xlu0 %620 }
  0xa3   : > { %v892_v17 = vsel %vm888_vm5, %v875_v14, %v623_v59  ;;  %v890_v18 = vsel %vm888_vm5, %v873_v8, %v621_v60 }
  0xa6   : > { %v627_v61 = vpop.permute.xlu1 %626  ;;  %v625_v62 = vpop.permute.xlu0 %624 }
  0xa7   : > { %v896_v38 = vsel %vm888_vm5, %v879_v36, %v627_v61  ;;  %v894_v16 = vsel %vm888_vm5, %v877_v37, %v625_v62 }
  0xaa   : > { %v663_v63 = vpop.permute.xlu1 %662  ;;  %v661_v0 = vpop.permute.xlu0 %660 }
  0xab   : > { %v909_v19 = vsel %vm905_vm6, %v892_v17, %v663_v63  ;;  %v907_v20 = vsel %vm905_vm6, %v890_v18, %v661_v0 }
  0xae   : > { %v667_v1 = vpop.permute.xlu1 %666  ;;  %v665_v2 = vpop.permute.xlu0 %664 }
  0xaf   : > { %v913_v30 = vsel %vm905_vm6, %v896_v38, %v667_v1  ;;  %v911_v39 = vsel %vm905_vm6, %v894_v16, %v665_v2 }
  0xb2   : > { %v703_v4 = vpop.permute.xlu1 %702  ;;  %v701_v9 = vpop.permute.xlu0 %700 }
  0xb3   : > { %v926_v21 = vsel %vm922_vm7, %v909_v19, %v703_v4  ;;  %v924_v23 = vsel %vm922_vm7, %v907_v20, %v701_v9 }
  0xb6   : > { %v707_v13 = vpop.permute.xlu1 %706  ;;  %v705_v15 = vpop.permute.xlu0 %704 }
  0xb7   : > { %v930_v40 = vsel %vm922_vm7, %v913_v30, %v707_v13  ;;  %v928_v42 = vsel %vm922_vm7, %v911_v39, %v705_v15 }
  0xba   : > { %v799_v22 = vpop.permute.xlu1 %798  ;;  %v797_v25 = vpop.permute.xlu0 %796 }
  0xbb   : > { %v943_v24 = vsel %vm939_vm8, %v926_v21, %v799_v22  ;;  %v941_v27 = vsel %vm939_vm8, %v924_v23, %v797_v25 }
  0xbc   : > { %v1462_v31 = vcombine.low %v941_v27, %v943_v24 }
  0xbe   : > { %v343_v34 = vpop.permute.xlu1 %342  ;;  %1529 = vmatprep.mubr.msk.bf16.mxu0 %vm1012_vm9, %v1462_v31  ;;  %v341_v11 = vpop.permute.xlu0 %340 }
  0xbf   : > { %v830_v14 = vsel %vm812_vm1, %v1792_v43, %v343_v34  ;;  %v827_v6 = vsel %vm812_vm1, %v1796_v45, %v341_v11 }
  0xc2   : > { %v803_v41 = vpop.permute.xlu1 %802  ;;  %v801_v46 = vpop.permute.xlu0 %800 }
  0xc3   : > { %v947_v44 = vsel %vm939_vm8, %v930_v40, %v803_v41  ;;  %v945_v47 = vsel %vm939_vm8, %v928_v42, %v801_v46 }
  0xc4   : > { %v1463_v48 = vcombine.low %v945_v47, %v947_v44 }
  0xc6   : > { %v347_v49 = vpop.permute.xlu1 %346  ;;  %1530 = vmatmul.mubr.msk.bf16.vlgmr.msra.gmra.mxu0 %vm1012_vm9, %v1463_v48  ;;  %v345_v50 = vpop.permute.xlu0 %344 }
  0xc7   : > { %v836_v22 = vsel %vm812_vm1, %v1809_v56, %v347_v49  ;;  %v833_v45 = vsel %vm812_vm1, %v1813_v58, %v345_v50  ;;  %v1639_v49 = vld [vmem:[%s2004_s2 + $0x8] sm:$0xff]   ;;  %v1640_v50 = vld [vmem:[%s2004_s2] sm:$0xff]  }
  0xc8   : > { %1539 = vmatprep.subr.bf16.mxu1 %v1639_v49 }
  0xc9   : > { %1540 = vmatpush3.bf16.msra.mxu1 %v1639_v49 }
  0xca   : > { %v455_v51 = vpop.permute.xlu1 %454  ;;  %v453_v52 = vpop.permute.xlu0 %452  ;;  %1541 = vmatprep.subr.bf16.mxu1 %v1640_v50 }
  0xcb   : > { %v849_v15 = vsel %vm837_vm2, %v830_v14, %v455_v51  ;;  %v847_v8 = vsel %vm837_vm2, %v827_v6, %v453_v52 }
  0xcd   : > { %1542 = vmatpush3.bf16.msra.mxu1 %v1640_v50 }
  0xce   : > { %v459_v53 = vpop.permute.xlu1 %458  ;;  %v457_v54 = vpop.permute.xlu0 %456 }
  0xcf   : > { %v853_v24 = vsel %vm837_vm2, %v836_v22, %v459_v53  ;;  %v851_v27 = vsel %vm837_vm2, %v833_v45, %v457_v54 }
  0xd2   : > { %v495_v55 = vpop.permute.xlu1 %494  ;;  %v493_v57 = vpop.permute.xlu0 %492 }
  0xd3   : > { %v866_v17 = vsel %vm854_vm3, %v849_v15, %v495_v55  ;;  %v864_v19 = vsel %vm854_vm3, %v847_v8, %v493_v57 }
  0xd6   : > { %v499_v59 = vpop.permute.xlu1 %498  ;;  %v497_v60 = vpop.permute.xlu0 %496 }
  0xd7   : > { %v870_v28 = vsel %vm854_vm3, %v853_v24, %v499_v59  ;;  %v868_v32 = vsel %vm854_vm3, %v851_v27, %v497_v60 }
  0xda   : > { %v535_v61 = vpop.permute.xlu1 %534  ;;  %v533_v62 = vpop.permute.xlu0 %532 }
  0xdb   : > { %v883_v20 = vsel %vm871_vm4, %v866_v17, %v535_v61  ;;  %v881_v43 = vsel %vm871_vm4, %v864_v19, %v533_v62 }
  0xde   : > { %v539_v63 = vpop.permute.xlu1 %538  ;;  %v537_v0 = vpop.permute.xlu0 %536 }
  0xdf   : > { %v887_v33 = vsel %vm871_vm4, %v870_v28, %v539_v63  ;;  %v885_v36 = vsel %vm871_vm4, %v868_v32, %v537_v0 }
  0xe2   : > { %v631_v1 = vpop.permute.xlu1 %630  ;;  %v629_v2 = vpop.permute.xlu0 %628 }
  0xe3   : > { %v900_v23 = vsel %vm888_vm5, %v883_v20, %v631_v1  ;;  %v898_v25 = vsel %vm888_vm5, %v881_v43, %v629_v2  ;;  %v1475_v1 = vld [vmem:[%s2005_s3] ss:$0 sm:$0xff] }
  0xe6   : > { %v635_v3 = vpop.permute.xlu1 %634  ;;  %v633_v4 = vpop.permute.xlu0 %632 }
  0xe7   : > { %v904_v11 = vsel %vm888_vm5, %v887_v33, %v635_v3  ;;  %v902_v38 = vsel %vm888_vm5, %v885_v36, %v633_v4  ;;  %v1483_v3 = vld [vmem:[%s2006_s4] ss:$0 sm:$0xff] }
  0xea   : > { %v671_v5 = vpop.permute.xlu1 %670  ;;  %v669_v7 = vpop.permute.xlu0 %668 }
  0xeb   : > { %v917_v26 = vsel %vm905_vm6, %v900_v23, %v671_v5  ;;  %v915_v29 = vsel %vm905_vm6, %v898_v25, %v669_v7 }
  0xee   : > { %v675_v9 = vpop.permute.xlu1 %674  ;;  %v673_v10 = vpop.permute.xlu0 %672 }
  0xef   : > { %v921_v16 = vsel %vm905_vm6, %v904_v11, %v675_v9  ;;  %v919_v39 = vsel %vm905_vm6, %v902_v38, %v673_v10 }
  0xf2   : > { %v711_v12 = vpop.permute.xlu1 %710  ;;  %v709_v13 = vpop.permute.xlu0 %708 }
  0xf3   : > { %v934_v56 = vsel %vm922_vm7, %v917_v26, %v711_v12  ;;  %v932_v58 = vsel %vm922_vm7, %v915_v29, %v709_v13 }
  0xf6   : > { %v715_v18 = vpop.permute.xlu1 %714  ;;  %v713_v21 = vpop.permute.xlu0 %712 }
  0xf7   : > { %v938_v40 = vsel %vm922_vm7, %v921_v16, %v715_v18  ;;  %v936_v42 = vsel %vm922_vm7, %v919_v39, %v713_v21 }
  0xfa   : > { %v807_v31 = vpop.permute.xlu1 %806  ;;  %v805_v35 = vpop.permute.xlu0 %804 }
  0xfb   : > { %v951_v34 = vsel %vm939_vm8, %v934_v56, %v807_v31  ;;  %v949_v37 = vsel %vm939_vm8, %v932_v58, %v805_v35 }
  0xfc   : > { %v1464_v30 = vcombine.low %v949_v37, %v951_v34 }
  0xfe   : > { %v811_v41 = vpop.permute.xlu1 %810  ;;  %1533 = vmatprep.mubr.msk.bf16.mxu0 %vm1012_vm9, %v1464_v30  ;;  %v809_v46 = vpop.permute.xlu0 %808 }
  0xff   : > { %v955_v44 = vsel %vm939_vm8, %v938_v40, %v811_v41  ;;  %v953_v47 = vsel %vm939_vm8, %v936_v42, %v809_v46 }
 0x100   : > { %v1465_v48 = vcombine.low %v953_v47, %v955_v44 }
 0x102   : > { %1534 = vmatmul.mubr.msk.bf16.gmra.mxu0 %vm1012_vm9, %v1465_v48 }
 0x186   : > { %v1531_v51 = vpop.f32.mrf.mxu0 }
 0x188   : > { %v1063_v52 = vpop.f32.mrf.mxu0 }
 0x18a   : > { %v1532_v53 = vpop.f32.mrf.mxu0 }
 0x18b   : > { %v1095_v57 = vpack.c.bf16 %v1532_v53, %v1531_v51 }
 0x18c   : > { %v1066_v54 = vpop.f32.mrf.mxu0 }
 0x18d   : > { %v1094_v55 = vpack.c.bf16 %v1066_v54, %v1063_v52 }
 0x18f   : > { %1543 = vmatprep.mubr.msk.bf16.mxu1 %vm905_vm6, %v1094_v55 }
 0x190   : > { %1544 = vmatmul.mubr.msk.bf16.vlgmr.msra.gmra.mxu1 %vm905_vm6, %v1095_v57 }
 0x1c2   : > { %v1535_v59 = vpop.f32.mrf.mxu0 }
 0x1c4   : > { %v1079_v60 = vpop.f32.mrf.mxu0 }
 0x1c6   : > { %v1536_v61 = vpop.f32.mrf.mxu0 }
 0x1c7   : > { %v1097_v0 = vpack.c.bf16 %v1536_v61, %v1535_v59 }
 0x1c8   : > { %v1082_v62 = vpop.f32.mrf.mxu0 }
 0x1c9   : > { %v1096_v63 = vpack.c.bf16 %v1082_v62, %v1079_v60 }
 0x1cb   : > { %1547 = vmatprep.mubr.msk.bf16.mxu1 %vm905_vm6, %v1096_v63 }
 0x1cc   : > { %1548 = vmatmul.mubr.msk.bf16.gmra.mxu1 %vm905_vm6, %v1097_v0 }
 0x250   : > { %v1545_v2 = vpop.f32.mrf.mxu1 }
 0x251   : > { %v1184_v4 = vadd.f32 %v1545_v2, %v1475_v1 }
 0x252   : > { %v1175_v5 = vpop.f32.mrf.mxu1 }
 0x253   : > { %vm1208_vm10 = vcmp.gt.f32.partialorder %v1184_v4, 0.0  ;;  %v1223_v7 = vmul.f32 %v1483_v3, %v1184_v4  ;;  %v1176_v9 = vadd.f32 %v1475_v1, %v1175_v5 }
 0x254   : > { %v1546_v10 = vpop.f32.mrf.mxu1 }
 0x255   : > { %v1231_v12 = vsel %vm1208_vm10, %v1184_v4, %v1223_v7  ;;  %vm1206_vm12 = vcmp.gt.f32.partialorder %v1176_v9, 0.0  ;;  %v1221_v13 = vmul.f32 %v1483_v3, %v1176_v9  ;;  %v1187_v14 = vadd.f32 %v1546_v10, %v1475_v1 }
 0x256   : > { %v1497_v6 = vpack.c.bf16 %v1231_v12, %v1231_v12  ;;  %v1178_v15 = vpop.f32.mrf.mxu1 }
 0x257   : > { %v1229_v8 = vsel %vm1206_vm12, %v1176_v9, %v1221_v13  ;;  %vm1209_vm13 = vcmp.gt.f32.partialorder %v1187_v14, 0.0  ;;  %v1224_v17 = vmul.f32 %v1483_v3, %v1187_v14  ;;  %v1179_v18 = vadd.f32 %v1475_v1, %v1178_v15 }
 0x258   : > { %1272 = vst.msk [vmem:[%s1981_s8 + $0x8] sm:$0xf] %vm1269_vm11, %v1497_v6  ;;  %v1495_v19 = vpack.c.bf16 %v1229_v8, %v1229_v8 }
 0x259   : > { %v1232_v20 = vsel %vm1209_vm13, %v1187_v14, %v1224_v17  ;;  %vm1207_vm14 = vcmp.gt.f32.partialorder %v1179_v18, 0.0  ;;  %v1222_v21 = vmul.f32 %v1483_v3, %v1179_v18 }
 0x25a   : > { %1270 = vst.msk [vmem:[%s1981_s8] sm:$0xf] %vm1269_vm11, %v1495_v19  ;;  %v1498_v22 = vpack.c.bf16 %v1232_v20, %v1232_v20 }
 0x25b   : > { %v1230_v43 = vsel %vm1207_vm14, %v1179_v18, %v1222_v21 }
 0x25c   : > { %1273 = vst.msk [vmem:[%s1981_s8 + $0xc] sm:$0xf] %vm1269_vm11, %v1498_v22  ;;  %v1496_v23 = vpack.c.bf16 %v1230_v43, %v1230_v43 }
 0x25e   : > { %1271 = vst.msk [vmem:[%s1981_s8 + $0x4] sm:$0xf] %vm1269_vm11, %v1496_v23 }
 0x28c   : > { %v1549_v45 = vpop.f32.mrf.mxu1 }
 0x28d   : > { %v1200_v24 = vadd.f32 %v1549_v45, %v1475_v1 }
 0x28e   : > { %v1191_v25 = vpop.f32.mrf.mxu1 }
 0x28f   : > { %vm1212_vm15 = vcmp.gt.f32.partialorder %v1200_v24, 0.0  ;;  %v1227_v26 = vmul.f32 %v1483_v3, %v1200_v24  ;;  %v1192_v27 = vadd.f32 %v1475_v1, %v1191_v25 }
 0x290   : > { %v1550_v28 = vpop.f32.mrf.mxu1 }
 0x291   : > { %v1235_v29 = vsel %vm1212_vm15, %v1200_v24, %v1227_v26  ;;  %vm1210_vm0 = vcmp.gt.f32.partialorder %v1192_v27, 0.0  ;;  %v1225_v56 = vmul.f32 %v1483_v3, %v1192_v27  ;;  %v1203_v31 = vadd.f32 %v1550_v28, %v1475_v1 }
 0x292   : > { %v1501_v32 = vpack.c.bf16 %v1235_v29, %v1235_v29  ;;  %v1194_v33 = vpop.f32.mrf.mxu1 }
 0x293   : > { %v1233_v58 = vsel %vm1210_vm0, %v1192_v27, %v1225_v56  ;;  %vm1213_vm1 = vcmp.gt.f32.partialorder %v1203_v31, 0.0  ;;  %v1228_v34 = vmul.f32 %v1483_v3, %v1203_v31  ;;  %v1195_v35 = vadd.f32 %v1475_v1, %v1194_v33 }
 0x294   : > { %1276 = vst.msk [vmem:[%s1981_s8 + $0x18] sm:$0xf] %vm1269_vm11, %v1501_v32  ;;  %v1499_v36 = vpack.c.bf16 %v1233_v58, %v1233_v58 }
 0x295   : > { %v1236_v11 = vsel %vm1213_vm1, %v1203_v31, %v1228_v34  ;;  %vm1211_vm2 = vcmp.gt.f32.partialorder %v1195_v35, 0.0  ;;  %v1226_v37 = vmul.f32 %v1483_v3, %v1195_v35 }
 0x296   : > { %1274 = vst.msk [vmem:[%s1981_s8 + $0x10] sm:$0xf] %vm1269_vm11, %v1499_v36  ;;  %v1502_v38 = vpack.c.bf16 %v1236_v11, %v1236_v11 }
 0x297   : > { %v1234_v16 = vsel %vm1211_vm2, %v1195_v35, %v1226_v37 }
 0x298   : > { %1277 = vst.msk [vmem:[%s1981_s8 + $0x1c] sm:$0xf] %vm1269_vm11, %v1502_v38  ;;  %v1500_v30 = vpack.c.bf16 %v1234_v16, %v1234_v16 }
 0x29a   : > { %1275 = vst.msk [vmem:[%s1981_s8 + $0x14] sm:$0xf] %vm1269_vm11, %v1500_v30 }
 0x29b PF: > { %s15_s18 = sadd.s32 1, %s1647_s18  }
 0x29c   : > { %p12_p5 = scmp.ge.s32.totalorder %s15_s18, 4  }
 0x29e   :  { %14 = sbr.rel (!%p12_p5) target bundleno = 1 (0x1), region = 75 }

// kernel: downsample_block_forward.3
= control target key start
LH: loop header
LB: loop body
LE: loop exit
PB: predicated region body
PF: predicated region fallthrough
CT: control target
= control target key end

     0   :  { %10 = vsyncpa [#allocation4], 0  ;;  %s2641_s0 = inlined_call_operand.vmem [shape: bf16[2,8,8,32], index: 0, kind: input, shape index: {}]   ;;  %s2642_s1 = inlined_call_operand.vmem [shape: bf16[144,32], index: 1, kind: input, shape index: {}]   ;;  %s2643_s2 = inlined_call_operand.vmem [shape: bf16[32,16], index: 2, kind: input, shape index: {}]   ;;  %s2644_s3 = inlined_call_operand.vmem [shape: f32[1,16], index: 3, kind: input, shape index: {}]   ;;  %s2645_s4 = inlined_call_operand.vmem [shape: f32[1,16], index: 4, kind: input, shape index: {}]   ;;  %s2646_s5 = inlined_call_operand.hbm [shape: f32[2,64,16], index: 5, kind: output, shape index: {}]  }
   0x1   :  { %12 = vsyncpa [#allocation4 + $0x1], 0  ;;  %s1931_s18 = smov 0   ;;  %s1933_s19 = smov 0  }
   0x2   :  { %s1935_s20 = smov 0   ;;  %s1937_s21 = smov 0  }
   0x3 LB: > { %s1952_s22 = sadd.s32 4294967295, %s1888_s21   ;;  %s1553_s23 = sadd.s32 4294967294, %s1888_s21   ;;  %s1888_s21 = sphi %s1937_s21, %s2656_s21   ;;  %s1884_s20 = sphi %s1935_s20, %s2655_s20   ;;  %s1880_s19 = sphi %s1933_s19, %s2654_s19   ;;  %s1876_s18 = sphi %s1931_s18, %s2653_s18  }
   0x4   : > { %s1956_s24 = sadd.s32 1, %s1888_s21   ;;  %s135_s25 = sadd.s32 1, %s1884_s20 }
   0x5   : > { %s132_s26 = ssub.s32 %s1888_s21, %s1956_s24  ;;  %p145_p0 = scmp.ne.s32.totalorder %s1884_s20, %s1880_s19 }
   0x6   : > { %p133_p1 = scmp.eq.s32.totalorder %s132_s26, 0  ;;  %p146_p2 = scmp.eq.s32.totalorder %s1952_s22, 1 }
   0x7   : > { %p151_p3 = scmp.ne.s32.totalorder %s1880_s19, %s1876_s18  ;;  %p152_p4 = scmp.eq.s32.totalorder %s1553_s23, 1 }
   0x8   : > { %s1967_s27 = scalar_select %p133_p1, %s1884_s20, %s135_s25  }
   0x9   : > { %p1969_p5 = por %p146_p2, %p145_p0  ;;  %p1973_p6 = por %p152_p4, %p151_p3 }
   0xa   : > { %p1556_p7 = scmp.ge.s32.totalorder %s1888_s21, 1  ;;  %p190_p8 = scmp.lt.s32.totalorder %s1888_s21, 3 }
   0xc   : > { %p191_p9 = pnand %p1556_p7, %p190_p8 }
   0xd   : > { %p218_p10 = scmp.lt.s32.totalorder (!%p191_p9), %s1952_s22, 1  ;;  %s1891_s10 = smov (!%p191_p9), 112  }
   0xe   : > { %194 = sbr.rel (%p191_p9) target bundleno = 809 (0x329), region = 40  ;;  %s1892_s11 = smov (!%p191_p9), 16  }
   0xf   : > { %s1893_s12 = smov (!%p191_p9), 96   ;;  %s1894_s13 = smov (!%p191_p9), 32  }
  0x10   : > { %s1895_s14 = smov (!%p191_p9), 48   ;;  %s1896_s25 = smov (!%p191_p9), 80  }
  0x11   : > { %s1897_s26 = smov (!%p191_p9), 64   ;;  %s1659_s23 = sshll.u32 (!%p191_p9), %s1952_s22, 10 }
  0x13   : > { %vm232_vm0 = vcmask 125952   ;;  %v1890_v0 = vmov 0   ;;  %vm234_vm1 = vcmask 122880   ;;  %s219_s30 = scalar_select %p218_p10, %s1952_s22, 1  ;;  %vm368_vm2 = vsmask.f32 7938 }
  0x14   : > { %238 = vst.msk [vmem:[#allocation2 + $0x10] sm:$0xf] %vm232_vm0, %v1890_v0  ;;  %233 = vst.msk [vmem:[#allocation2] sm:$0xf] %vm232_vm0, %v1890_v0  ;;  %1253 = vmatprep.subr.bf16.mxu0 %v1890_v0  ;;  %1678 = vmatprep.subr.bf16.mxu1 %v1890_v0  ;;  %vm374_vm4 = vsmask.f32 256 }
  0x15   : > { %236 = vst.msk [vmem:[#allocation2 + $0x8] sm:$0xf] %vm232_vm0, %v1890_v0  ;;  %240 = vst.msk [vmem:[#allocation2 + $0x18] sm:$0xf] %vm232_vm0, %v1890_v0  ;;  %s1658_s6 = sshll.u32 %s219_s30, 5  ;;  %vm1006_vm6 = vcmask 130048  }
  0x16   : > { %242 = vst.msk [vmem:[#allocation2 + $0x20] sm:$0xf] %vm232_vm0, %v1890_v0  ;;  %244 = vst.msk [vmem:[#allocation2 + $0x28] sm:$0xf] %vm232_vm0, %v1890_v0  ;;  %s2028_s9 = scalar_lea.vmem %s2641_s0, %s1658_s6  ;;  %vm1031_vm7 = vcmask 261120   ;;  %vm1048_vm8 = vcmask 392192   ;;  %s2593_s6 = scalar_lea.hbm %s2646_s5, %s1659_s23 }
  0x17   : > { %246 = vst.msk [vmem:[#allocation2 + $0x30] sm:$0xf] %vm232_vm0, %v1890_v0  ;;  %248 = vst.msk [vmem:[#allocation2 + $0x38] sm:$0xf] %vm232_vm0, %v1890_v0  ;;  %v225_v1 = vld [vmem:[%s2028_s9 + $0x4] sm:$0xf] }
  0x18   : > { %250 = vst.msk [vmem:[#allocation2 + $0x40] sm:$0xf] %vm232_vm0, %v1890_v0  ;;  %252 = vst.msk [vmem:[#allocation2 + $0x48] sm:$0xf] %vm232_vm0, %v1890_v0  ;;  %v224_v2 = vld [vmem:[%s2028_s9] sm:$0xf] }
  0x19   : > { %239 = vst.msk [vmem:[#allocation2 + $0x14] sm:$0x1] %vm234_vm1, %v1890_v0  ;;  %235 = vst.msk [vmem:[#allocation2 + $0x4] sm:$0x1] %vm234_vm1, %v1890_v0  ;;  %v226_v3 = vld [vmem:[%s2028_s9 + $0x8] sm:$0xf] }
  0x1a   : > { %237 = vst.msk [vmem:[#allocation2 + $0xc] sm:$0x1] %vm234_vm1, %v1890_v0  ;;  %241 = vst.msk [vmem:[#allocation2 + $0x1c] sm:$0x1] %vm234_vm1, %v1890_v0  ;;  %v263_v4 = vshrl.u32 %v225_v1, 16  ;;  %v266_v5 = vshll.u32 %v225_v1, 16 }
  0x1b   : > { %243 = vst.msk [vmem:[#allocation2 + $0x24] sm:$0x1] %vm234_vm1, %v1890_v0  ;;  %245 = vst.msk [vmem:[#allocation2 + $0x2c] sm:$0x1] %vm234_vm1, %v1890_v0  ;;  %v255_v6 = vshrl.u32 %v224_v2, 16  ;;  %v258_v7 = vshll.u32 %v224_v2, 16 }
  0x1c   : > { %247 = vst.msk [vmem:[#allocation2 + $0x34] sm:$0x1] %vm234_vm1, %v1890_v0  ;;  %249 = vst.msk [vmem:[#allocation2 + $0x3c] sm:$0x1] %vm234_vm1, %v1890_v0  ;;  %v265_v8 = vrot.slane %v263_v4, 7  ;;  %v271_v10 = vshrl.u32 %v226_v3, 16 }
  0x1d   : > { %251 = vst.msk [vmem:[#allocation2 + $0x44] sm:$0x1] %vm234_vm1, %v1890_v0  ;;  %253 = vst.msk [vmem:[#allocation2 + $0x4c] sm:$0x1] %vm234_vm1, %v1890_v0  ;;  %v257_v9 = vrot.slane %v255_v6, 7  ;;  %v274_v14 = vshll.u32 %v226_v3, 16 }
  0x1e   : > { %v227_v11 = vld [vmem:[%s2028_s9 + $0xc] sm:$0xf]  ;;  %v268_v12 = vor.u32 %v266_v5, %v265_v8  ;;  %v269_v15 = vrot.slane %v265_v8, 4  ;;  %v273_v17 = vrot.slane %v271_v10, 7  ;;  %v228_v19 = vld [vmem:[%s2028_s9 + $0x10] sm:$0xf]  ;;  %vm2066_vm3 = vmand %vm232_vm0, %vm368_vm2 }
  0x1f   : > { %v260_v13 = vor.u32 %v258_v7, %v257_v9  ;;  %v261_v16 = vrot.slane %v257_v9, 4  ;;  %v279_v18 = vshrl.u32 %v227_v11, 16  ;;  %v282_v20 = vshll.u32 %v227_v11, 16  ;;  %v229_v25 = vld [vmem:[%s2028_s9 + $0x14] sm:$0xf]  ;;  %vm2075_vm5 = vmand %vm234_vm1, %vm374_vm4 }
  0x20   : > { %322 = vrot.lane.b32.xlu1 %v268_v12, %s1891_s10  ;;  %v277_v21 = vrot.slane %v273_v17, 4  ;;  %v276_v22 = vor.u32 %v274_v14, %v273_v17  ;;  %v287_v24 = vshrl.u32 %v228_v19, 16  ;;  %v290_v26 = vshll.u32 %v228_v19, 16  ;;  %v230_v31 = vld [vmem:[%s2028_s9 + $0x18] sm:$0xf] }
  0x21   : > { %318 = vrot.lane.b32.xlu0 %v260_v13, %s1891_s10  ;;  %v281_v23 = vrot.slane %v279_v18, 7  ;;  %v295_v27 = vshrl.u32 %v229_v25, 16  ;;  %v231_v32 = vld [vmem:[%s2028_s9 + $0x1c] sm:$0xf]  ;;  %v298_v34 = vshll.u32 %v229_v25, 16  ;;  %v303_v37 = vshrl.u32 %v230_v31, 16 }
  0x22   : > { %v289_v30 = vrot.slane %v287_v24, 7  ;;  %v2046_v38 = vld [vmem:[#allocation2] sm:$0xf]  ;;  %v429_v39 = vld [vmem:[#allocation2 + $0x4] sm:$0x1]  ;;  %v306_v40 = vshll.u32 %v230_v31, 16 }
  0x23   : > { %v285_v28 = vrot.slane %v281_v23, 4  ;;  %v284_v29 = vor.u32 %v282_v20, %v281_v23  ;;  %v297_v33 = vrot.slane %v295_v27, 7  ;;  %v311_v41 = vshrl.u32 %v231_v32, 16  ;;  %v437_v55 = vld [vmem:[#allocation2] sm:$0xe] }
  0x24   : > { %324 = vrot.lane.b32.xlu1 %v269_v15, %s1891_s10  ;;  %v293_v35 = vrot.slane %v289_v30, 4  ;;  %v292_v36 = vor.u32 %v290_v26, %v289_v30  ;;  %v305_v44 = vrot.slane %v303_v37, 7  ;;  %v1560_v45 = vcombine.low %v2046_v38, %v429_v39  ;;  %v477_v56 = vld [vmem:[#allocation2 + $0x48] sm:$0xf]  ;;  %v2055_v57 = vld [vmem:[#allocation2 + $0x4c] sm:$0x1] }
  0x25   : > { %320 = vrot.lane.b32.xlu0 %v261_v16, %s1891_s10  ;;  %v301_v42 = vrot.slane %v297_v33, 4  ;;  %v300_v43 = vor.u32 %v298_v34, %v297_v33  ;;  %v314_v46 = vshll.u32 %v231_v32, 16  ;;  %v313_v49 = vrot.slane %v311_v41, 7  ;;  %v379_v1 = vld [vmem:[#allocation2 + $0x10] sm:$0xf] }
  0x26   : > { %v309_v47 = vrot.slane %v305_v44, 4  ;;  %v308_v48 = vor.u32 %v306_v40, %v305_v44  ;;  %v537_v50 = vshll.u32 %v1560_v45, 16  ;;  %v535_v53 = vshrl.u32 %v1560_v45, 16  ;;  %v370_v2 = vld [vmem:[#allocation2 + $0x8] sm:$0xf] }
  0x27   : > { %v317_v51 = vrot.slane %v313_v49, 4  ;;  %v316_v52 = vor.u32 %v314_v46, %v313_v49  ;;  %v2058_v58 = vcombine.low %v477_v56, %v2055_v57  ;;  %v1568_v60 = vcombine.low %v437_v55, %v429_v39  ;;  %v382_v8 = vld [vmem:[#allocation2 + $0x14] sm:$0x1]  ;;  %v376_v9 = vld [vmem:[#allocation2 + $0xc] sm:$0x1] }
  0x28   : > { %328 = vrot.lane.b32.xlu1 %v277_v21, %s1891_s10  ;;  %v539_v54 = vrot.slane %v537_v50, 1  ;;  %v1607_v61 = vcombine.low %v477_v56, %v477_v56  ;;  %v388_v14 = vld [vmem:[#allocation2 + $0x1c] sm:$0x1]  ;;  %v385_v15 = vld [vmem:[#allocation2 + $0x18] sm:$0xf]  ;;  %vm1065_vm9 = vcmask 523264  }
  0x29   : > { %326 = vrot.lane.b32.xlu0 %v276_v22, %s1891_s10  ;;  %v630_v62 = vrot.slane %v1568_v60, 1  ;;  %v394_v23 = vld [vmem:[#allocation2 + $0x24] sm:$0x1]  ;;  %v391_v25 = vld [vmem:[#allocation2 + $0x20] sm:$0xf]  ;;  %vm1082_vm10 = vcmask 654336  }
  0x2a   : > { %v540_v59 = vor.u32 %v539_v54, %v535_v53  ;;  %v400_v33 = vld [vmem:[#allocation2 + $0x2c] sm:$0x1]  ;;  %v397_v34 = vld [vmem:[#allocation2 + $0x28] sm:$0xf]  ;;  %v406_v45 = vld [vmem:[#allocation2 + $0x34] sm:$0x1] }
  0x2b   : > { %v412_v56 = vld [vmem:[#allocation2 + $0x3c] sm:$0x1]  ;;  %v493_v7 = vld [vmem:[#allocation2 + $0x48] sm:$0xe]  ;;  %vm1099_vm11 = vcmask 785408   ;;  %vm1116_vm12 = vcmask 916480  }
  0x2c   : > { %332 = vrot.lane.b32.xlu1 %v285_v28, %s1891_s10 }
  0x2d   : > { %330 = vrot.lane.b32.xlu0 %v284_v29, %s1891_s10 }
  0x30   : > { %336 = vrot.lane.b32.xlu1 %v293_v35, %s1891_s10 }
  0x31   : > { %334 = vrot.lane.b32.xlu0 %v292_v36, %s1891_s10 }
  0x34   : > { %340 = vrot.lane.b32.xlu1 %v301_v42, %s1891_s10 }
  0x35   : > { %338 = vrot.lane.b32.xlu0 %v300_v43, %s1891_s10 }
  0x38   : > { %344 = vrot.lane.b32.xlu1 %v309_v47, %s1891_s10 }
  0x39   : > { %342 = vrot.lane.b32.xlu0 %v308_v48, %s1891_s10  ;;  %v403_v48 = vld [vmem:[#allocation2 + $0x30] sm:$0xf] }
  0x3c   : > { %348 = vrot.lane.b32.xlu1 %v317_v51, %s1891_s10 }
  0x3d   : > { %346 = vrot.lane.b32.xlu0 %v316_v52, %s1891_s10 }
  0x40   : > { %876 = vrot.lane.b32.xlu1 %v1607_v61, %s1893_s12 }
  0x41   : > { %590 = vrot.lane.b32.xlu0 %v540_v59, %s1892_s11 }
  0x45   : > { %638 = vrot.lane.b32.xlu0 %v630_v62, %s1894_s13 }
  0x92   : > { %v323_v3 = vpop.permute.xlu1 %322 }
  0x93   : > { %v319_v4 = vpop.permute.xlu0 %318  ;;  %v380_v5 = vsel %vm2066_vm3, %v323_v3, %v379_v1  ;;  %v409_v1 = vld [vmem:[#allocation2 + $0x38] sm:$0xf] }
  0x94   : > { %v371_v6 = vsel %vm2066_vm3, %v319_v4, %v370_v2  ;;  %381 = vst [vmem:[#allocation2 + $0x10] sm:$0xf] %v380_v5 }
  0x95   : > { %372 = vst [vmem:[#allocation2 + $0x8] sm:$0xf] %v371_v6 }
  0x96   : > { %v325_v10 = vpop.permute.xlu1 %324 }
  0x97   : > { %v321_v11 = vpop.permute.xlu0 %320  ;;  %v383_v12 = vsel %vm2075_vm5, %v325_v10, %v382_v8 }
  0x98   : > { %v377_v13 = vsel %vm2075_vm5, %v321_v11, %v376_v9  ;;  %384 = vst [vmem:[#allocation2 + $0x14] sm:$0x1] %v383_v12  ;;  %v418_v9 = vld [vmem:[#allocation2 + $0x44] sm:$0x1]  ;;  %v415_v11 = vld [vmem:[#allocation2 + $0x40] sm:$0xf] }
  0x99   : > { %378 = vst [vmem:[#allocation2 + $0xc] sm:$0x1] %v377_v13 }
  0x9a   : > { %v329_v16 = vpop.permute.xlu1 %328 }
  0x9b   : > { %v327_v17 = vpop.permute.xlu0 %326  ;;  %v389_v18 = vsel %vm2075_vm5, %v329_v16, %v388_v14  ;;  %v2089_v21 = vld [vmem:[#allocation2 + $0x10] sm:$0xf] }
  0x9c   : > { %v386_v19 = vsel %vm2066_vm3, %v327_v17, %v385_v15  ;;  %v2087_v20 = vld [vmem:[#allocation2 + $0x8] sm:$0xf]  ;;  %v2091_v22 = vld [vmem:[#allocation2 + $0x10] sm:$0xf]  ;;  %390 = vst [vmem:[#allocation2 + $0x1c] sm:$0x1] %v389_v18  ;;  %v1577_v26 = vcombine.low %v2089_v21, %v2089_v21 }
  0x9d   : > { %387 = vst [vmem:[#allocation2 + $0x18] sm:$0xf] %v386_v19  ;;  %v1576_v24 = vcombine.low %v2087_v20, %v2087_v20  ;;  %v1600_v29 = vcombine.low %v2091_v22, %v2091_v22  ;;  %v486_v30 = vld [vmem:[#allocation2 + $0x10] sm:$0xe] }
  0x9e   : > { %v333_v27 = vpop.permute.xlu1 %332  ;;  %680 = vrot.lane.b32.xlu1 %v1577_v26, %s1895_s14 }
  0x9f   : > { %678 = vrot.lane.b32.xlu0 %v1576_v24, %s1895_s14  ;;  %v331_v28 = vpop.permute.xlu0 %330  ;;  %v395_v31 = vsel %vm2075_vm5, %v333_v27, %v394_v23  ;;  %v2105_v35 = vld [vmem:[#allocation2 + $0x14] sm:$0x1] }
  0xa0   : > { %v392_v32 = vsel %vm2066_vm3, %v331_v28, %v391_v25  ;;  %396 = vst [vmem:[#allocation2 + $0x24] sm:$0x1] %v395_v31  ;;  %v1616_v36 = vcombine.low %v486_v30, %v2105_v35 }
  0xa1   : > { %393 = vst [vmem:[#allocation2 + $0x20] sm:$0xf] %v392_v32  ;;  %v1623_v32 = vcombine.low %v493_v7, %v2055_v57 }
  0xa2   : > { %v337_v37 = vpop.permute.xlu1 %336  ;;  %v998_v51 = vrot.slane %v1616_v36, 1 }
  0xa3   : > { %862 = vrot.lane.b32.xlu0 %v1600_v29, %s1893_s12  ;;  %v335_v39 = vpop.permute.xlu0 %334  ;;  %v401_v40 = vsel %vm2075_vm5, %v337_v37, %v400_v33  ;;  %v2117_v44 = vld [vmem:[#allocation2 + $0x1c] sm:$0x1] }
  0xa4   : > { %v398_v41 = vsel %vm2066_vm3, %v335_v39, %v397_v34  ;;  %v2113_v42 = vld [vmem:[#allocation2 + $0x18] sm:$0xf]  ;;  %402 = vst [vmem:[#allocation2 + $0x2c] sm:$0x1] %v401_v40 }
  0xa5   : > { %v2115_v43 = vld [vmem:[#allocation2 + $0x18] sm:$0xf]  ;;  %399 = vst [vmem:[#allocation2 + $0x28] sm:$0xf] %v398_v41  ;;  %v1601_v46 = vcombine.low %v2113_v42, %v2113_v42 }
  0xa6   : > { %v1578_v47 = vcombine.low %v2115_v43, %v2115_v43  ;;  %v487_v49 = vld [vmem:[#allocation2 + $0x18] sm:$0xe]  ;;  %v341_v52 = vpop.permute.xlu1 %340 }
  0xa7   : > { %v1617_v50 = vcombine.low %v487_v49, %v2117_v44  ;;  %864 = vrot.lane.b32.xlu1 %v1601_v46, %s1893_s12  ;;  %v339_v53 = vpop.permute.xlu0 %338  ;;  %v407_v54 = vsel %vm2075_vm5, %v341_v52, %v406_v45  ;;  %v2155_v17 = vld [vmem:[#allocation2 + $0x24] sm:$0x1]  ;;  %v1005_v46 = vrot.slane %v1623_v32, 1  ;;  %v2192_v49 = vld [vmem:[#allocation2 + $0xc] sm:$0x1] }
  0xa8   : > { %682 = vrot.lane.b32.xlu0 %v1578_v47, %s1895_s14  ;;  %v404_v55 = vsel %vm2066_vm3, %v339_v53, %v403_v48  ;;  %v2130_v60 = vld [vmem:[#allocation2 + $0x20] sm:$0xf]  ;;  %408 = vst [vmem:[#allocation2 + $0x34] sm:$0x1] %v407_v54  ;;  %v2198_v52 = vld [vmem:[#allocation2 + $0xc] sm:$0x1] }
  0xa9   : > { %v999_v59 = vrot.slane %v1617_v50, 1  ;;  %405 = vst [vmem:[#allocation2 + $0x30] sm:$0xf] %v404_v55  ;;  %v1602_v61 = vcombine.low %v2130_v60, %v2130_v60  ;;  %v2134_v62 = vld [vmem:[#allocation2 + $0x20] sm:$0xf] }
  0xaa   : > { %v1579_v3 = vcombine.low %v2134_v62, %v2134_v62  ;;  %v345_v4 = vpop.permute.xlu1 %344  ;;  %v488_v18 = vld [vmem:[#allocation2 + $0x20] sm:$0xe]  ;;  %v461_v53 = vld [vmem:[#allocation2 + $0x8] sm:$0xe] }
  0xab   : > { %v1625_v2 = vcombine.low %v998_v51, %v999_v59  ;;  %v343_v5 = vpop.permute.xlu0 %342  ;;  %v413_v6 = vsel %vm2075_vm5, %v345_v4, %v412_v56  ;;  %v2147_v12 = vld [vmem:[#allocation2 + $0x2c] sm:$0x1]  ;;  %v1618_v29 = vcombine.low %v488_v18, %v2155_v17  ;;  %v1592_v56 = vcombine.low %v461_v53, %v2192_v49  ;;  %v438_v59 = vld [vmem:[#allocation2 + $0x8] sm:$0xe]  ;;  %v462_v4 = vld [vmem:[#allocation2 + $0x10] sm:$0xe] }
  0xac   : > { %866 = vrot.lane.b32.xlu0 %v1602_v61, %s1893_s12  ;;  %684 = vrot.lane.b32.xlu1 %v1579_v3, %s1895_s14  ;;  %v410_v8 = vsel %vm2066_vm3, %v343_v5, %v409_v1  ;;  %v2145_v10 = vld [vmem:[#allocation2 + $0x28] sm:$0xf]  ;;  %414 = vst [vmem:[#allocation2 + $0x3c] sm:$0x1] %v413_v6  ;;  %v1569_v1 = vcombine.low %v438_v59, %v2198_v52  ;;  %v1809_v3 = vld [vmem:[%s2642_s1 + $0x38] sm:$0xff]  }
  0xad   : > { %1641 = vmatprep.mubr.msk.bf16.mxu0 %vm1006_vm6, %v1625_v2  ;;  %411 = vst [vmem:[#allocation2 + $0x38] sm:$0xf] %v410_v8  ;;  %v489_v13 = vld [vmem:[#allocation2 + $0x28] sm:$0xe]  ;;  %v1603_v14 = vcombine.low %v2145_v10, %v2145_v10  ;;  %v2177_v33 = vrot.slane %v1618_v29, 1  ;;  %1254 = vmatpush1.bf16.msra.mxu0 %v1809_v3  ;;  %v814_v8 = vrot.slane %v1592_v56, 1 }
  0xae   : > { %v2151_v15 = vld [vmem:[#allocation2 + $0x28] sm:$0xf]  ;;  %v349_v19 = vpop.permute.xlu1 %348  ;;  %v1619_v25 = vcombine.low %v489_v13, %v2147_v12  ;;  %v439_v2 = vld [vmem:[#allocation2 + $0x10] sm:$0xe]  ;;  %v2210_v5 = vld [vmem:[#allocation2 + $0x14] sm:$0x1]  ;;  %1255 = vmatprep.subr.bf16.mxu0 %v1890_v0  ;;  %1687 = vmatpush1.bf16.msra.mxu1 %v1809_v3 }
  0xaf   : > { %v1580_v16 = vcombine.low %v2151_v15, %v2151_v15  ;;  %v347_v23 = vpop.permute.xlu0 %346  ;;  %v419_v24 = vsel %vm2075_vm5, %v349_v19, %v418_v9  ;;  %v2212_v6 = vld [vmem:[#allocation2 + $0x14] sm:$0x1]  ;;  %v1570_v9 = vcombine.low %v439_v2, %v2210_v5  ;;  %v463_v13 = vld [vmem:[#allocation2 + $0x18] sm:$0xe]  ;;  %v631_v18 = vrot.slane %v1569_v1, 1  ;;  %1679 = vmatprep.subr.bf16.mxu1 %v1890_v0  ;;  %v1812_v1 = vld [vmem:[%s2642_s1 + $0x20] sm:$0xff]  }
  0xb0   : > { %868 = vrot.lane.b32.xlu1 %v1603_v14, %s1893_s12  ;;  %v416_v26 = vsel %vm2066_vm3, %v347_v23, %v415_v11  ;;  %v2164_v27 = vld [vmem:[#allocation2 + $0x30] sm:$0xf]  ;;  %420 = vst [vmem:[#allocation2 + $0x44] sm:$0x1] %v419_v24  ;;  %v2169_v30 = vrot.slane %v1619_v25, 1  ;;  %v1593_v19 = vcombine.low %v462_v4, %v2212_v6 }
  0xb1   : > { %686 = vrot.lane.b32.xlu0 %v1580_v16, %s1895_s14  ;;  %417 = vst [vmem:[#allocation2 + $0x40] sm:$0xf] %v416_v26  ;;  %v1581_v28 = vcombine.low %v2164_v27, %v2164_v27  ;;  %v2179_v34 = vld [vmem:[#allocation2 + $0x30] sm:$0xf]  ;;  %v2215_v11 = vld [vmem:[#allocation2 + $0x1c] sm:$0x1] }
  0xb2   : > { %v1627_v40 = vcombine.low %v2177_v33, %v2169_v30  ;;  %v1604_v41 = vcombine.low %v2179_v34, %v2179_v34  ;;  %v1810_v23 = vld [vmem:[%s2642_s1 + $0x30] sm:$0xff]   ;;  %v2226_v24 = vld [vmem:[#allocation2 + $0x1c] sm:$0x1]  ;;  %v440_v25 = vld [vmem:[#allocation2 + $0x18] sm:$0xe]  ;;  %v632_v7 = vrot.slane %v1570_v9, 1 }
  0xb3   : > { %v2218_v14 = vld [vmem:[#allocation2 + $0x3c] sm:$0x1]  ;;  %v2228_v26 = vld [vmem:[#allocation2 + $0x34] sm:$0x1]  ;;  %1256 = vmatpush1.bf16.msra.mxu0 %v1810_v23  ;;  %1688 = vmatpush1.bf16.msra.mxu1 %v1810_v23  ;;  %v815_v32 = vrot.slane %v1593_v19, 1 }
  0xb4   : > { %688 = vrot.lane.b32.xlu1 %v1581_v28, %s1895_s14  ;;  %v2172_v31 = vld [vmem:[#allocation2 + $0x38] sm:$0xf]  ;;  %v490_v28 = vld [vmem:[#allocation2 + $0x30] sm:$0xe]  ;;  %1257 = vmatprep.subr.bf16.mxu0 %v1890_v0  ;;  %v2251_v59 = vld [vmem:[#allocation2 + $0x34] sm:$0x1] }
  0xb5   : > { %v1582_v63 = vcombine.low %v2172_v31, %v2172_v31  ;;  %v2196_v51 = vld [vmem:[#allocation2 + $0x38] sm:$0xf]  ;;  %1680 = vmatprep.subr.bf16.mxu1 %v1890_v0  ;;  %v2260_v3 = vld [vmem:[#allocation2 + $0x2c] sm:$0x1]  ;;  %v442_v4 = vld [vmem:[#allocation2 + $0x28] sm:$0xe] }
  0xb6   : > { %v1605_v61 = vcombine.low %v2196_v51, %v2196_v51  ;;  %v491_v16 = vld [vmem:[#allocation2 + $0x38] sm:$0xe]  ;;  %v2268_v19 = vld [vmem:[#allocation2 + $0x2c] sm:$0x1]  ;;  %v465_v23 = vld [vmem:[#allocation2 + $0x28] sm:$0xe] }
  0xb7   : > { %690 = vrot.lane.b32.xlu0 %v1582_v63, %s1895_s14  ;;  %v484_v37 = vld [vmem:[#allocation2 + $0x44] sm:$0x1]  ;;  %v1621_v29 = vcombine.low %v491_v16, %v2218_v14  ;;  %v1594_v63 = vcombine.low %v463_v13, %v2215_v11 }
  0xb8   : > { %v2182_v36 = vld [vmem:[#allocation2 + $0x40] sm:$0xf] }
  0xb9   : > { %v492_v39 = vld [vmem:[#allocation2 + $0x40] sm:$0xe]  ;;  %v1583_v45 = vcombine.low %v2182_v36, %v2182_v36  ;;  %v816_v53 = vrot.slane %v1594_v63, 1 }
  0xba   : > { %v1622_v57 = vcombine.low %v492_v39, %v484_v37  ;;  %v476_v47 = vld [vmem:[#allocation2 + $0x40] sm:$0xf]  ;;  %v2235_v39 = vld [vmem:[#allocation2 + $0x24] sm:$0x1] }
  0xbb   : > { %v2190_v48 = vcombine.low %v476_v47, %v484_v37  ;;  %870 = vrot.lane.b32.xlu0 %v1604_v41, %s1893_s12  ;;  %692 = vrot.lane.b32.xlu1 %v1583_v45, %s1895_s14  ;;  %v1606_v55 = vcombine.low %v476_v47, %v476_v47  ;;  %v1571_v37 = vcombine.low %v440_v25, %v2226_v24  ;;  %v441_v41 = vld [vmem:[#allocation2 + $0x20] sm:$0xe]  ;;  %v1811_v45 = vld [vmem:[%s2642_s1 + $0x28] sm:$0xff]   ;;  %v1813_v25 = vld [vmem:[%s2642_s1 + $0x18] sm:$0xff]   ;;  %s215_s14 = sand.u32 1, %s1880_s19  }
  0xbc   : > { %v1004_v50 = vrot.slane %v1622_v57, 1  ;;  %v1620_v57 = vcombine.low %v490_v28, %v2228_v26  ;;  %v464_v47 = vld [vmem:[#allocation2 + $0x20] sm:$0xe]  ;;  %1258 = vmatpush1.bf16.msra.mxu0 %v1811_v45  ;;  %1689 = vmatpush1.bf16.msra.mxu1 %v1811_v45  ;;  %v2275_v28 = vld [vmem:[#allocation2 + $0x3c] sm:$0x1]  ;;  %s1557_s15 = sshll.u32 %s215_s14, 6 }
  0xbd   : > { %1259 = vmatprep.subr.bf16.mxu0 %v1890_v0  ;;  %1681 = vmatprep.subr.bf16.mxu1 %v1890_v0  ;;  %v2283_v45 = vld [vmem:[#allocation2 + $0x3c] sm:$0x1]  ;;  %s2601_s22 = scalar_lea.sflag [#allocation4], %s215_s14 }
  0xbe   : > { %v1631_v54 = vcombine.low %v1004_v50, %v1005_v46  ;;  %v2243_v46 = vld [vmem:[#allocation2 + $0x24] sm:$0x1]  ;;  %v2246_v50 = vrot.slane %v1621_v29, 1  ;;  %v2257_v2 = vrot.slane %v1620_v57, 1  ;;  %v444_v29 = vld [vmem:[#allocation2 + $0x38] sm:$0xe] }
  0xbf   : > { %874 = vrot.lane.b32.xlu0 %v1606_v55, %s1893_s12  ;;  %872 = vrot.lane.b32.xlu1 %v1605_v61, %s1893_s12  ;;  %v633_v55 = vrot.slane %v1571_v37, 1  ;;  %v1595_v56 = vcombine.low %v464_v47, %v2243_v46  ;;  %v443_v61 = vld [vmem:[#allocation2 + $0x30] sm:$0xe]  ;;  %v467_v57 = vld [vmem:[#allocation2 + $0x38] sm:$0xe] }
  0xc0   : > { %1644 = vmatprep.mubr.msk.bf16.mxu1 %vm1006_vm6, %v1631_v54  ;;  %v1572_v54 = vcombine.low %v441_v41, %v2235_v39  ;;  %1260 = vmatpush1.bf16.msra.mxu0 %v1812_v1  ;;  %v1574_v9 = vcombine.low %v443_v61, %v2251_v59  ;;  %v1629_v13 = vcombine.low %v2257_v2, %v2246_v50  ;;  %v2287_v47 = vld [vmem:[#allocation2 + $0x34] sm:$0x1] }
  0xc1   : > { %1261 = vmatprep.subr.bf16.mxu0 %v1890_v0  ;;  %1690 = vmatpush1.bf16.msra.mxu1 %v1812_v1  ;;  %v817_v16 = vrot.slane %v1595_v56, 1  ;;  %v1575_v41 = vcombine.low %v444_v29, %v2275_v28  ;;  %v1598_v56 = vcombine.low %v467_v57, %v2283_v45  ;;  %v1585_v29 = vcombine.low %v2089_v21, %v2212_v6  ;;  %v1816_v21 = vld [vmem:[%s2642_s1] sm:$0xff]   ;;  %v2326_v6 = vld [vmem:[#allocation2 + $0x18] sm:$0xf] }
  0xc2   : > { %1682 = vmatprep.subr.bf16.mxu1 %v1890_v0  ;;  %v636_v63 = vrot.slane %v1574_v9, 1 }
  0xc3   : > { %822 = vrot.lane.b32.xlu0 %v814_v8, %s1896_s25  ;;  %640 = vrot.lane.b32.xlu1 %v631_v18, %s1894_s13  ;;  %v634_v8 = vrot.slane %v1572_v54, 1  ;;  %v1573_v18 = vcombine.low %v442_v4, %v2260_v3  ;;  %v2295_v54 = vld [vmem:[#allocation2 + $0x8] sm:$0xf]  ;;  %v2300_v4 = vld [vmem:[#allocation2 + $0x10] sm:$0xf] }
  0xc4   : > { %1262 = vmatpush1.bf16.msra.mxu0 %v1813_v25  ;;  %v1561_v1 = vcombine.low %v2295_v54, %v2198_v52  ;;  %v1815_v52 = vld [vmem:[%s2642_s1 + $0x8] sm:$0xff]  }
  0xc5   : > { %1263 = vmatprep.subr.bf16.mxu0 %v1890_v0  ;;  %1691 = vmatpush1.bf16.msra.mxu1 %v1813_v25  ;;  %v635_v37 = vrot.slane %v1573_v18, 1  ;;  %v820_v18 = vrot.slane %v1598_v56, 1 }
  0xc6   : > { %1683 = vmatprep.subr.bf16.mxu1 %v1890_v0 }
  0xc7   : > { %642 = vrot.lane.b32.xlu0 %v632_v7, %s1894_s13  ;;  %824 = vrot.lane.b32.xlu1 %v815_v32, %s1896_s25  ;;  %v1584_v7 = vcombine.low %v2087_v20, %v2192_v49  ;;  %v1596_v32 = vcombine.low %v465_v23, %v2268_v19  ;;  %v1814_v20 = vld [vmem:[%s2642_s1 + $0x10] sm:$0xff]   ;;  %v1608_v49 = vcombine.low %v2091_v22, %v2105_v35  ;;  %v2306_v22 = vld [vmem:[#allocation2 + $0x44] sm:$0x1]  ;;  %v468_v35 = vld [vmem:[#allocation2 + $0x40] sm:$0xe] }
  0xc8   : > { %1264 = vmatpush1.bf16.msra.mxu0 %v1814_v20 }
  0xc9   : > { %v721_v61 = vshll.u32 %v1584_v7, 16  ;;  %1692 = vmatpush1.bf16.msra.mxu1 %v1814_v20  ;;  %1265 = vmatprep.subr.bf16.mxu0 %v1890_v0  ;;  %v905_v25 = vshll.u32 %v1608_v49, 16 }
  0xca   : > { %1684 = vmatprep.subr.bf16.mxu1 %v1890_v0 }
  0xcb   : > { %826 = vrot.lane.b32.xlu0 %v816_v53, %s1896_s25  ;;  %644 = vrot.lane.b32.xlu1 %v633_v55, %s1894_s13  ;;  %v466_v53 = vld [vmem:[#allocation2 + $0x30] sm:$0xe]  ;;  %v818_v55 = vrot.slane %v1596_v32, 1  ;;  %v723_v23 = vrot.slane %v721_v61, 1  ;;  %v1599_v32 = vcombine.low %v468_v35, %v2306_v22  ;;  %v907_v20 = vrot.slane %v905_v25, 1 }
  0xcc   : > { %v1597_v9 = vcombine.low %v466_v53, %v2287_v47  ;;  %1266 = vmatpush1.bf16.msra.mxu0 %v1815_v52  ;;  %v903_v53 = vshrl.u32 %v1608_v49, 16  ;;  %v1563_v49 = vcombine.low %v2326_v6, %v2226_v24 }
  0xcd   : > { %1693 = vmatpush1.bf16.msra.mxu1 %v1815_v52  ;;  %1267 = vmatprep.subr.bf16.mxu0 %v1890_v0  ;;  %v821_v56 = vrot.slane %v1599_v32, 1  ;;  %v2349_v32 = vld [vmem:[#allocation2 + $0x30] sm:$0xf] }
  0xce   : > { %1685 = vmatprep.subr.bf16.mxu1 %v1890_v0 }
  0xcf   : > { %646 = vrot.lane.b32.xlu0 %v634_v8, %s1894_s13  ;;  %828 = vrot.lane.b32.xlu1 %v817_v16, %s1896_s25  ;;  %v637_v8 = vrot.slane %v1575_v41, 1  ;;  %v1562_v16 = vcombine.low %v2300_v4, %v2210_v5  ;;  %v719_v41 = vshrl.u32 %v1584_v7, 16  ;;  %v1586_v5 = vcombine.low %v2115_v43, %v2215_v11 }
  0xd0   : > { %v1609_v7 = vcombine.low %v2113_v42, %v2117_v44  ;;  %v728_v43 = vshll.u32 %v1585_v29, 16  ;;  %1268 = vmatpush1.bf16.msra.mxu0 %v1816_v21  ;;  %v1610_v11 = vcombine.low %v2130_v60, %v2155_v17  ;;  %v1817_v42 = vld [vmem:[%s2642_s1 + $0x40] sm:$0xff]   ;;  %v908_v44 = vor.u32 %v907_v20, %v903_v53 }
  0xd1   : > { %v724_v57 = vor.u32 %v723_v23, %v719_v41  ;;  %1694 = vmatpush1.bf16.msra.mxu1 %v1816_v21  ;;  %1283 = vmatprep.subr.bf16.mxu0 %v1890_v0  ;;  %v735_v52 = vshll.u32 %v1586_v5, 16  ;;  %v726_v60 = vshrl.u32 %v1585_v29, 16  ;;  %v558_v41 = vshll.u32 %v1563_v49, 16 }
  0xd2   : > { %1686 = vmatprep.subr.bf16.mxu1 %v1890_v0  ;;  %v730_v17 = vrot.slane %v728_v43, 1  ;;  %v912_v25 = vshll.u32 %v1609_v7, 16  ;;  %v733_v21 = vshrl.u32 %v1586_v5, 16  ;;  %v2357_v43 = vld [vmem:[#allocation2 + $0x28] sm:$0xf]  ;;  %v917_v5 = vshrl.u32 %v1610_v11, 16 }
  0xd3   : > { %650 = vrot.lane.b32.xlu0 %v636_v63, %s1894_s13  ;;  %648 = vrot.lane.b32.xlu1 %v635_v37, %s1894_s13  ;;  %v819_v63 = vrot.slane %v1597_v9, 1  ;;  %v544_v37 = vshll.u32 %v1561_v1, 16  ;;  %v549_v9 = vshrl.u32 %v1562_v16, 16 }
  0xd4   : > { %1284 = vmatpush2.bf16.msra.mxu0 %v1817_v42  ;;  %v731_v29 = vor.u32 %v730_v17, %v726_v60 }
  0xd5   : > { %v546_v61 = vrot.slane %v544_v37, 1  ;;  %1695 = vmatpush2.bf16.msra.mxu1 %v1817_v42  ;;  %v914_v37 = vrot.slane %v912_v25, 1 }
  0xd7   : > { %830 = vrot.lane.b32.xlu0 %v818_v55, %s1896_s25  ;;  %652 = vrot.lane.b32.xlu1 %v637_v8, %s1894_s13  ;;  %v551_v55 = vshll.u32 %v1562_v16, 16  ;;  %v542_v8 = vshrl.u32 %v1561_v1, 16  ;;  %v737_v1 = vrot.slane %v735_v52, 1  ;;  %v919_v16 = vshll.u32 %v1610_v11, 16  ;;  %v2365_v52 = vld [vmem:[#allocation2 + $0x38] sm:$0xf] }
  0xd8   : > { %s2557_s13 = scalar_lea.vmem [#allocation3], %s1557_s15 }
  0xd9   : > { %v553_v35 = vrot.slane %v551_v55, 1  ;;  %v547_v23 = vor.u32 %v546_v61, %v542_v8  ;;  %v738_v53 = vor.u32 %v737_v1, %v733_v21  ;;  %v921_v20 = vrot.slane %v919_v16, 1 }
  0xda   : > { %v1612_v16 = vcombine.low %v2179_v34, %v2228_v26  ;;  %v1591_v34 = vcombine.low %v2182_v36, %v2306_v22 }
  0xdb   : > { %834 = vrot.lane.b32.xlu0 %v820_v18, %s1896_s25  ;;  %832 = vrot.lane.b32.xlu1 %v819_v63, %s1896_s25  ;;  %v2341_v18 = vld [vmem:[#allocation2 + $0x20] sm:$0xf]  ;;  %v554_v0 = vor.u32 %v553_v35, %v549_v9  ;;  %v1587_v63 = vcombine.low %v2134_v62, %v2243_v46  ;;  %v1611_v62 = vcombine.low %v2145_v10, %v2147_v12 }
  0xdc   : > { %v1564_v24 = vcombine.low %v2341_v18, %v2235_v39  ;;  %v1566_v39 = vcombine.low %v2349_v32, %v2251_v59  ;;  %v1588_v59 = vcombine.low %v2151_v15, %v2268_v19  ;;  %v922_v8 = vor.u32 %v921_v20, %v917_v5 }
  0xdd   : > { %v742_v61 = vshll.u32 %v1587_v63, 16  ;;  %v1565_v10 = vcombine.low %v2357_v43, %v2260_v3  ;;  %v926_v35 = vshll.u32 %v1611_v62, 16  ;;  %v1590_v15 = vcombine.low %v2172_v31, %v2283_v45 }
  0xde   : > { %v565_v55 = vshll.u32 %v1564_v24, 16  ;;  %v563_v11 = vshrl.u32 %v1564_v24, 16  ;;  %v749_v60 = vshll.u32 %v1588_v59, 16  ;;  %v1567_v3 = vcombine.low %v2365_v52, %v2275_v28 }
  0xdf   : > { %774 = vrot.lane.b32.xlu0 %v724_v57, %s1897_s26  ;;  %836 = vrot.lane.b32.xlu1 %v821_v56, %s1896_s25  ;;  %v910_v57 = vshrl.u32 %v1609_v7, 16  ;;  %v560_v56 = vrot.slane %v558_v41, 1  ;;  %v556_v7 = vshrl.u32 %v1563_v49, 16  ;;  %v744_v9 = vrot.slane %v742_v61, 1 }
  0xe0   : > { %v567_v42 = vrot.slane %v565_v55, 1  ;;  %v740_v49 = vshrl.u32 %v1587_v63, 16  ;;  %v928_v25 = vrot.slane %v926_v35, 1  ;;  %v577_v1 = vshrl.u32 %v1566_v39, 16 }
  0xe1   : > { %v915_v46 = vor.u32 %v914_v37, %v910_v57  ;;  %v561_v12 = vor.u32 %v560_v56, %v556_v7  ;;  %v924_v24 = vshrl.u32 %v1611_v62, 16  ;;  %v751_v31 = vrot.slane %v749_v60, 1 }
  0xe2   : > { %v568_v19 = vor.u32 %v567_v42, %v563_v11  ;;  %v745_v17 = vor.u32 %v744_v9, %v740_v49  ;;  %v763_v45 = vshll.u32 %v1590_v15, 16  ;;  %v586_v41 = vshll.u32 %v1567_v3, 16  ;;  %v591_v49 = vpop.permute.xlu0 %590 }
  0xe3   : > { %958 = vrot.lane.b32.xlu0 %v908_v44, %s1891_s10  ;;  %592 = vrot.lane.b32.xlu1 %v547_v23, %s1892_s11  ;;  %v579_v44 = vshll.u32 %v1566_v39, 16  ;;  %v929_v37 = vor.u32 %v928_v25, %v924_v24  ;;  %v747_v21 = vshrl.u32 %v1588_v59, 16  ;;  %v570_v57 = vshrl.u32 %v1565_v10, 16 }
  0xe4   : > { %v933_v20 = vshll.u32 %v1612_v16, 16  ;;  %v588_v55 = vrot.slane %v586_v41, 1  ;;  %v947_v61 = vshll.u32 %v2190_v48, 16  ;;  %v1613_v5 = vcombine.low %v2196_v51, %v2218_v14 }
  0xe5   : > { %v581_v23 = vrot.slane %v579_v44, 1  ;;  %v752_v39 = vor.u32 %v751_v31, %v747_v21  ;;  %v931_v36 = vshrl.u32 %v1612_v16, 16  ;;  %v945_v35 = vshrl.u32 %v2190_v48, 16 }
  0xe6   : > { %v935_v56 = vrot.slane %v933_v20, 1  ;;  %v949_v44 = vrot.slane %v947_v61, 1  ;;  %v940_v9 = vshll.u32 %v1613_v5, 16  ;;  %v768_v51 = vshrl.u32 %v1591_v34, 16  ;;  %v639_v25 = vpop.permute.xlu0 %638 }
  0xe7   : > { %594 = vrot.lane.b32.xlu0 %v554_v0, %s1892_s11  ;;  %776 = vrot.lane.b32.xlu1 %v731_v29, %s1897_s26  ;;  %v572_v0 = vshll.u32 %v1565_v10, 16  ;;  %v582_v63 = vor.u32 %v581_v23, %v577_v1  ;;  %v1589_v29 = vcombine.low %v2164_v27, %v2287_v47  ;;  %v761_v27 = vshrl.u32 %v1590_v15, 16 }
  0xe8   : > { %v584_v47 = vshrl.u32 %v1567_v3, 16  ;;  %v936_v42 = vor.u32 %v935_v56, %v931_v36  ;;  %v954_v14 = vshll.u32 %v2058_v58, 16  ;;  %v950_v11 = vor.u32 %v949_v44, %v945_v35 }
  0xe9   : > { %v574_v28 = vrot.slane %v572_v0, 1  ;;  %v756_v62 = vshll.u32 %v1589_v29, 16  ;;  %v754_v22 = vshrl.u32 %v1589_v29, 16  ;;  %v938_v23 = vshrl.u32 %v1613_v5, 16  ;;  %v2398_v0 = vpop.permute.xlu1 %876 }
  0xea   : > { %v589_v7 = vor.u32 %v588_v55, %v584_v47  ;;  %v952_v60 = vshrl.u32 %v2058_v58, 16  ;;  %v956_v3 = vrot.slane %v954_v14, 1  ;;  %v1009_v36 = vsel %vm1006_vm6, %v2046_v38, %v591_v49 }
  0xeb   : > { %778 = vrot.lane.b32.xlu0 %v738_v53, %s1897_s26  ;;  %960 = vrot.lane.b32.xlu1 %v915_v46, %s1891_s10  ;;  %v765_v53 = vrot.slane %v763_v45, 1  ;;  %v575_v26 = vor.u32 %v574_v28, %v570_v57  ;;  %v758_v59 = vrot.slane %v756_v62, 1 }
  0xec   : > { %v957_v48 = vor.u32 %v956_v3, %v952_v60 }
  0xed   : > { %v766_v46 = vor.u32 %v765_v53, %v761_v27  ;;  %v759_v10 = vor.u32 %v758_v59, %v754_v22 }
  0xef   : > { %962 = vrot.lane.b32.xlu0 %v922_v8, %s1891_s10  ;;  %596 = vrot.lane.b32.xlu1 %v561_v12, %s1892_s11  ;;  %v770_v8 = vshll.u32 %v1591_v34, 16 }
  0xf1   : > { %v772_v12 = vrot.slane %v770_v8, 1 }
  0xf3   : > { %598 = vrot.lane.b32.xlu0 %v568_v19, %s1892_s11  ;;  %780 = vrot.lane.b32.xlu1 %v745_v17, %s1897_s26  ;;  %v773_v15 = vor.u32 %v772_v12, %v768_v51  ;;  %v942_v19 = vrot.slane %v940_v9, 1 }
  0xf5   : > { %v943_v17 = vor.u32 %v942_v19, %v938_v23 }
  0xf7   : > { %602 = vrot.lane.b32.xlu0 %v582_v63, %s1892_s11  ;;  %964 = vrot.lane.b32.xlu1 %v929_v37, %s1891_s10 }
  0xfb   : > { %782 = vrot.lane.b32.xlu0 %v752_v39, %s1897_s26  ;;  %600 = vrot.lane.b32.xlu1 %v575_v26, %s1892_s11 }
  0xff   : > { %786 = vrot.lane.b32.xlu0 %v766_v46, %s1897_s26  ;;  %604 = vrot.lane.b32.xlu1 %v589_v7, %s1892_s11  ;;  %s1898_s11 = smov [#allocation3]  }
 0x100   : > { %s1832_s25 = sshll.u32 %s1898_s11, 4  ;;  %s1833_s25 = int_to_ptr.vmem [resolvable:$false] %s1832_s25 }
 0x101   : > { %s1834_s7 = scalar_lea.vmem %s1833_s25, 2048 }
 0x103   : > { %966 = vrot.lane.b32.xlu0 %v936_v42, %s1891_s10  ;;  %784 = vrot.lane.b32.xlu1 %v759_v10, %s1897_s26  ;;  %v1033_v42 = vsel %vm1031_vm7, %v1009_v36, %v639_v25 }
 0x107   : > { %970 = vrot.lane.b32.xlu0 %v950_v11, %s1891_s10  ;;  %788 = vrot.lane.b32.xlu1 %v773_v15, %s1897_s26 }
 0x10b   : > { %968 = vrot.lane.b32.xlu1 %v943_v17, %s1891_s10 }
 0x10f   : > { %972 = vrot.lane.b32.xlu1 %v957_v48, %s1891_s10 }
 0x110   : > { %v681_v24 = vpop.permute.xlu1 %680 }
 0x111   : > { %v679_v1 = vpop.permute.xlu0 %678 }
 0x112   : > { %v1050_v10 = vsel %vm1048_vm8, %v1033_v42, %v679_v1 }
 0x115   : > { %v863_v16 = vpop.permute.xlu0 %862 }
 0x119   : > { %v865_v63 = vpop.permute.xlu1 %864 }
 0x11a   : > { %v683_v31 = vpop.permute.xlu0 %682 }
 0x11e   : > { %v2401_v45 = vpop.permute.xlu1 %684  ;;  %v2403_v29 = vpop.permute.xlu0 %866 }
 0x122   : > { %v2405_v58 = vpop.permute.xlu1 %868 }
 0x123   : > { %v2407_v37 = vpop.permute.xlu0 %686 }
 0x126   : > { %v2409_v28 = vpop.permute.xlu1 %688 }
 0x129   : > { %v2411_v41 = vpop.permute.xlu0 %690 }
 0x12d   : > { %v2413_v21 = vpop.permute.xlu1 %692  ;;  %v2415_v57 = vpop.permute.xlu0 %870 }
 0x131   : > { %v2417_v39 = vpop.permute.xlu0 %874  ;;  %v2419_v53 = vpop.permute.xlu1 %872 }
 0x135   : > { %v823_v20 = vpop.permute.xlu0 %822  ;;  %v641_v34 = vpop.permute.xlu1 %640 }
 0x139   : > { %v643_v26 = vpop.permute.xlu0 %642  ;;  %v825_v55 = vpop.permute.xlu1 %824 }
 0x13d   : > { %v827_v62 = vpop.permute.xlu0 %826  ;;  %v645_v27 = vpop.permute.xlu1 %644 }
 0x141   : > { %v647_v47 = vpop.permute.xlu0 %646  ;;  %v829_v46 = vpop.permute.xlu1 %828 }
 0x145   : > { %v2421_v56 = vpop.permute.xlu0 %650  ;;  %v2423_v61 = vpop.permute.xlu1 %648 }
 0x149   : > { %v2425_v5 = vpop.permute.xlu0 %830  ;;  %v2427_v7 = vpop.permute.xlu1 %652 }
 0x14d   : > { %v2429_v59 = vpop.permute.xlu0 %834  ;;  %v2431_v8 = vpop.permute.xlu1 %832 }
 0x151   : > { %v775_v22 = vpop.permute.xlu0 %774  ;;  %v2436_v44 = vpop.permute.xlu1 %836 }
 0x152   : > { %v1067_v9 = vsel %vm1065_vm9, %v1050_v10, %v775_v22 }
 0x153   : > { %v1084_v14 = vsel %vm1082_vm10, %v1067_v9, %v823_v20 }
 0x154   : > { %v1101_v60 = vsel %vm1099_vm11, %v1084_v14, %v863_v16 }
 0x155   : > { %v959_v12 = vpop.permute.xlu0 %958  ;;  %v593_v35 = vpop.permute.xlu1 %592 }
 0x156   : > { %v1012_v51 = vsel %vm1006_vm6, %v2295_v54, %v593_v35  ;;  %v1118_v1 = vsel %vm1116_vm12, %v1101_v60, %v959_v12 }
 0x157   : > { %v1035_v38 = vsel %vm1031_vm7, %v1012_v51, %v641_v34 }
 0x158   : > { %v1052_v11 = vsel %vm1048_vm8, %v1035_v38, %v681_v24 }
 0x159   : > { %v595_v49 = vpop.permute.xlu0 %594  ;;  %v777_v15 = vpop.permute.xlu1 %776 }
 0x15a   : > { %v1015_v19 = vsel %vm1006_vm6, %v2300_v4, %v595_v49  ;;  %v1069_v23 = vsel %vm1065_vm9, %v1052_v11, %v777_v15 }
 0x15b   : > { %v1086_v3 = vsel %vm1082_vm10, %v1069_v23, %v825_v55  ;;  %v1037_v54 = vsel %vm1031_vm7, %v1015_v19, %v643_v26 }
 0x15c   : > { %v1103_v17 = vsel %vm1099_vm11, %v1086_v3, %v865_v63  ;;  %v1054_v20 = vsel %vm1048_vm8, %v1037_v54, %v683_v31 }
 0x15d   : > { %v779_v25 = vpop.permute.xlu0 %778  ;;  %v961_v48 = vpop.permute.xlu1 %960 }
 0x15e   : > { %v1120_v24 = vsel %vm1116_vm12, %v1103_v17, %v961_v48  ;;  %v1071_v36 = vsel %vm1065_vm9, %v1054_v20, %v779_v25 }
 0x15f   : > { %v1624_v4 = vcombine.low %v1118_v1, %v1120_v24  ;;  %v1088_v26 = vsel %vm1082_vm10, %v1071_v36, %v827_v62  ;;  %v1818_v1 = vld [vmem:[%s2643_s2 + $0x8] sm:$0xff]  }
 0x160   : > { %1666 = vmatprep.subr.bf16.mxu1 %v1818_v1 }
 0x161   : > { %v963_v34 = vpop.permute.xlu0 %962  ;;  %v597_v16 = vpop.permute.xlu1 %596  ;;  %1286 = vmatmul.mubr.bf16.vlgmr.msra.gmra.mxu0 %v1624_v4 }
 0x162   : > { %v1018_v55 = vsel %vm1006_vm6, %v2326_v6, %v597_v16  ;;  %1642 = vmatprep.mubr.msk.bf16.mxu0 %vm1006_vm6, %v1627_v40  ;;  %v1105_v6 = vsel %vm1099_vm11, %v1088_v26, %v2403_v29 }
 0x163   : > { %v1039_v63 = vsel %vm1031_vm7, %v1018_v55, %v645_v27 }
 0x164   : > { %v1056_v31 = vsel %vm1048_vm8, %v1039_v63, %v2401_v45  ;;  %v1122_v45 = vsel %vm1116_vm12, %v1105_v6, %v963_v34 }
 0x165   : > { %v599_v22 = vpop.permute.xlu0 %598  ;;  %v781_v42 = vpop.permute.xlu1 %780 }
 0x166   : > { %v1073_v10 = vsel %vm1065_vm9, %v1056_v31, %v781_v42  ;;  %v1021_v12 = vsel %vm1006_vm6, %v2341_v18, %v599_v22 }
 0x167   : > { %v1090_v30 = vsel %vm1082_vm10, %v1073_v10, %v829_v46  ;;  %v1041_v62 = vsel %vm1031_vm7, %v1021_v12, %v647_v47 }
 0x168   : > { %v1107_v33 = vsel %vm1099_vm11, %v1090_v30, %v2405_v58  ;;  %v1058_v29 = vsel %vm1048_vm8, %v1041_v62, %v2407_v37 }
 0x169   : > { %v603_v40 = vpop.permute.xlu0 %602  ;;  %v965_v27 = vpop.permute.xlu1 %964 }
 0x16a   : > { %v1124_v9 = vsel %vm1116_vm12, %v1107_v33, %v965_v27  ;;  %v1027_v35 = vsel %vm1006_vm6, %v2349_v32, %v603_v40  ;;  %v2538_v27 = vld [vmem:[%s2644_s3] ss:$0 sm:$0xff] }
 0x16b   : > { %v1626_v18 = vcombine.low %v1122_v45, %v1124_v9  ;;  %v1045_v46 = vsel %vm1031_vm7, %v1027_v35, %v2421_v56  ;;  %v1820_v45 = vld [vmem:[%s2028_s9 + $0x8] sm:$0xf] }
 0x16c   : > { %v1062_v56 = vsel %vm1048_vm8, %v1045_v46, %v2411_v41  ;;  %v1424_v9 = vunpack.c.l.bf16 %v1820_v45  ;;  %v2549_v46 = vld [vmem:[%s2645_s4] ss:$0 sm:$0xff] }
 0x16d   : > { %v783_v51 = vpop.permute.xlu0 %782  ;;  %v601_v58 = vpop.permute.xlu1 %600  ;;  %1294 = vmatmul.mubr.bf16.gmra.mxu0 %v1626_v18 }
 0x16e   : > { %v1075_v47 = vsel %vm1065_vm9, %v1058_v29, %v783_v51  ;;  %1643 = vmatprep.mubr.msk.bf16.mxu0 %vm1006_vm6, %v1629_v13  ;;  %v1024_v37 = vsel %vm1006_vm6, %v2357_v43, %v601_v58  ;;  %v1821_v29 = vld [vmem:[%s2028_s9] sm:$0xf] }
 0x16f   : > { %v1092_v38 = vsel %vm1082_vm10, %v1075_v47, %v2425_v5  ;;  %v1043_v50 = vsel %vm1031_vm7, %v1024_v37, %v2423_v61  ;;  %v1422_v51 = vunpack.c.l.bf16 %v1821_v29 }
 0x170   : > { %v1109_v32 = vsel %vm1099_vm11, %v1092_v38, %v2415_v57  ;;  %v1060_v41 = vsel %vm1048_vm8, %v1043_v50, %v2409_v28  ;;  %v1823_v50 = vld [vmem:[%s2028_s9 + $0x4] sm:$0xf] }
 0x171   : > { %v787_v14 = vpop.permute.xlu0 %786  ;;  %v605_v11 = vpop.permute.xlu1 %604 }
 0x172   : > { %v1079_v49 = vsel %vm1065_vm9, %v1062_v56, %v787_v14  ;;  %v1030_v13 = vsel %vm1006_vm6, %v2365_v52, %v605_v11 }
 0x173   : > { %v1096_v5 = vsel %vm1082_vm10, %v1079_v49, %v2429_v59  ;;  %v1047_v57 = vsel %vm1031_vm7, %v1030_v13, %v2427_v7 }
 0x174   : > { %v1113_v2 = vsel %vm1099_vm11, %v1096_v5, %v2417_v39  ;;  %v1064_v39 = vsel %vm1048_vm8, %v1047_v57, %v2413_v21 }
 0x175   : > { %v785_v43 = vpop.permute.xlu1 %784  ;;  %v967_v19 = vpop.permute.xlu0 %966 }
 0x176   : > { %v1077_v15 = vsel %vm1065_vm9, %v1060_v41, %v785_v43  ;;  %v1126_v28 = vsel %vm1116_vm12, %v1109_v32, %v967_v19  ;;  %v1822_v32 = vld [vmem:[%s2028_s9 + $0xc] sm:$0xf] }
 0x177   : > { %v1094_v61 = vsel %vm1082_vm10, %v1077_v15, %v2431_v8  ;;  %v1425_v37 = vunpack.c.l.bf16 %v1822_v32 }
 0x178   : > { %v1111_v52 = vsel %vm1099_vm11, %v1094_v61, %v2419_v53 }
 0x179   : > { %v789_v59 = vpop.permute.xlu1 %788  ;;  %v971_v54 = vpop.permute.xlu0 %970 }
 0x17a   : > { %v1081_v23 = vsel %vm1065_vm9, %v1064_v39, %v789_v59  ;;  %v1130_v21 = vsel %vm1116_vm12, %v1113_v2, %v971_v54  ;;  %v1423_v2 = vunpack.c.l.bf16 %v1823_v50 }
 0x17b   : > { %v1098_v7 = vsel %vm1082_vm10, %v1081_v23, %v2436_v44  ;;  %v1819_v44 = vld [vmem:[%s2643_s2] sm:$0xff]  }
 0x17c   : > { %v1115_v8 = vsel %vm1099_vm11, %v1098_v7, %v2398_v0 }
 0x17d   : > { %v969_v60 = vpop.permute.xlu1 %968 }
 0x17e   : > { %v1128_v3 = vsel %vm1116_vm12, %v1111_v52, %v969_v60  ;;  %v1824_v52 = vld [vmem:[%s2028_s9 + $0x18] sm:$0xf] }
 0x17f   : > { %v1628_v17 = vcombine.low %v1126_v28, %v1128_v3  ;;  %v1428_v60 = vunpack.c.l.bf16 %v1824_v52  ;;  %v1825_v3 = vld [vmem:[%s2028_s9 + $0x10] sm:$0xf] }
 0x180   : > { %v1426_v54 = vunpack.c.l.bf16 %v1825_v3 }
 0x181   : > { %v973_v25 = vpop.permute.xlu1 %972  ;;  %1302 = vmatmul.mubr.bf16.gmra.mxu0 %v1628_v17 }
 0x182   : > { %v1132_v48 = vsel %vm1116_vm12, %v1115_v8, %v973_v25 }
 0x183   : > { %v1630_v53 = vcombine.low %v1130_v21, %v1132_v48  ;;  %v1826_v21 = vld [vmem:[%s2028_s9 + $0x1c] sm:$0xf] }
 0x184   : > { %v1429_v48 = vunpack.c.l.bf16 %v1826_v21 }
 0x185   : > { %1310 = vmatmul.mubr.bf16.vlgmr.msra.gmra.mxu1 %v1630_v53 }
 0x186   : > { %1667 = vmatpush3.bf16.msra.mxu1 %v1818_v1 }
 0x187   : > { %1668 = vmatprep.subr.bf16.mxu1 %v1819_v44 }
 0x18a   : > { %1669 = vmatpush3.bf16.msra.mxu1 %v1819_v44 }
 0x221   : > { %v1287_v0 = vpop.f32.mrf.mxu0 }
 0x223   : > { %v1289_v24 = vpop.f32.mrf.mxu0 }
 0x225   : > { %v1290_v20 = vpop.f32.mrf.mxu0 }
 0x226   : > { %v1318_v4 = vpack.c.bf16 %v1290_v20, %v1287_v0  ;;  %v1827_v20 = vld [vmem:[%s2028_s9 + $0x14] sm:$0xf]  ;;  %s1491_s9 = sshll.u32 %s2557_s13, 4  ;;  %s2595_s9 = int_to_ptr.vmem [resolvable:$true] %s1491_s9 }
 0x227   : > { %v1292_v34 = vpop.f32.mrf.mxu0  ;;  %s1828_s10 = scalar_lea.vmem %s2595_s9, 1024  ;;  %p1835_p0 = scmp.lt.s32.totalorder %s2595_s9, %s1833_s25 }
 0x228   : > { %1670 = vmatprep.mubr.msk.bf16.mxu1 %vm1031_vm7, %v1318_v4  ;;  %v1427_v4 = vunpack.c.l.bf16 %v1827_v20  ;;  %p1829_p11 = scmp.ne.s32.totalorder %s2595_s9, %s1828_s10  ;;  %p1836_p1 = scmp.lt.s32.totalorder %s1834_s7, %s1828_s10 }
 0x22a   : > { %p1830_p12 = pnand %p1829_p11, %p1969_p5  ;;  %p1837_p2 = por %p1836_p1, %p1835_p0 }
 0x22c   : > { %p1831_p13 = pneg %p1830_p12 }
 0x22d   : > { %v1295_v36 = vpop.f32.mrf.mxu0 }
 0x22e   : > { %p1838_p3 = pnand %p1837_p2, %p1831_p13 }
 0x22f   : > { %v1297_v16 = vpop.f32.mrf.mxu0 }
 0x231   : > { %v1298_v55 = vpop.f32.mrf.mxu0 }
 0x232   : > { %v1319_v63 = vpack.c.bf16 %v1298_v55, %v1295_v36 }
 0x233   : > { %v1300_v26 = vpop.f32.mrf.mxu0 }
 0x234   : > { %1671 = vmatmul.mubr.msk.bf16.vlgmr.msra.gmra.mxu1 %vm1031_vm7, %v1319_v63 }
 0x241   : > { %v1303_v31 = vpop.f32.mrf.mxu0 }
 0x243   : > { %v1305_v22 = vpop.f32.mrf.mxu0 }
 0x245   : > { %v1306_v42 = vpop.f32.mrf.mxu0  ;;  %v1311_v10 = vpop.f32.mrf.mxu1 }
 0x246   : > { %v1320_v12 = vpack.c.bf16 %v1306_v42, %v1303_v31 }
 0x247   : > { %v1308_v6 = vpop.f32.mrf.mxu0  ;;  %v1313_v30 = vpop.f32.mrf.mxu1 }
 0x248   : > { %1674 = vmatprep.mubr.msk.bf16.mxu1 %vm1031_vm7, %v1320_v12 }
 0x249   : > { %v1314_v33 = vpop.f32.mrf.mxu1 }
 0x24a   : > { %v1321_v40 = vpack.c.bf16 %v1314_v33, %v1311_v10 }
 0x24b   : > { %v1316_v62 = vpop.f32.mrf.mxu1 }
 0x24c   : > { %1675 = vmatmul.mubr.msk.bf16.gmra.mxu1 %vm1031_vm7, %v1321_v40 }
 0x2f4   : > { %v1672_v35 = vpop.f32.mrf.mxu1 }
 0x2f5   : > { %v1400_v18 = vadd.f32 %v1672_v35, %v2538_v27 }
 0x2f6   : > { %v1391_v58 = vpop.f32.mrf.mxu1 }
 0x2f7   : > { %v1432_v47 = vadd.f32 %v1424_v9, %v1400_v18  ;;  %v1392_v38 = vadd.f32 %v2538_v27, %v1391_v58 }
 0x2f8   : > { %v1673_v56 = vpop.f32.mrf.mxu1 }
 0x2f9   : > { %vm1440_vm13 = vcmp.gt.f32.partialorder %v1432_v47, 0.0  ;;  %v1455_v14 = vmul.f32 %v2549_v46, %v1432_v47  ;;  %v1430_v11 = vadd.f32 %v1422_v51, %v1392_v38  ;;  %v1403_v49 = vadd.f32 %v1673_v56, %v2538_v27 }
 0x2fa   : > { %v1394_v5 = vpop.f32.mrf.mxu1 }
 0x2fb   : > { %v1463_v13 = vsel %vm1440_vm13, %v1432_v47, %v1455_v14  ;;  %vm1438_vm14 = vcmp.gt.f32.partialorder %v1430_v11, 0.0  ;;  %v1453_v43 = vmul.f32 %v2549_v46, %v1430_v11  ;;  %v1433_v41 = vadd.f32 %v1425_v37, %v1403_v49 }
 0x2fc   : > { %1471 = vst.msk [vmem:[%s2557_s13 + $0x10] sm:$0xff] %vm1006_vm6, %v1463_v13  ;;  %v1395_v57 = vadd.f32 %v2538_v27, %v1394_v5 }
 0x2fd   : > { %v1461_v15 = vsel %vm1438_vm14, %v1430_v11, %v1453_v43  ;;  %vm1441_vm15 = vcmp.gt.f32.partialorder %v1433_v41, 0.0  ;;  %v1456_v19 = vmul.f32 %v2549_v46, %v1433_v41 }
 0x2fe   : > { %1469 = vst.msk [vmem:[%s2557_s13] sm:$0xff] %vm1006_vm6, %v1461_v15  ;;  %v1431_v59 = vadd.f32 %v1423_v2, %v1395_v57 }
 0x2ff   : > { %v1464_v61 = vsel %vm1441_vm15, %v1433_v41, %v1456_v19 }
 0x300   : > { %1472 = vst.msk [vmem:[%s2557_s13 + $0x18] sm:$0xff] %vm1006_vm6, %v1464_v61  ;;  %vm1439_vm0 = vcmp.gt.f32.partialorder %v1431_v59, 0.0  ;;  %v1454_v39 = vmul.f32 %v2549_v46, %v1431_v59 }
 0x302   : > { %v1462_v23 = vsel %vm1439_vm0, %v1431_v59, %v1454_v39 }
 0x303   : > { %1470 = vst.msk [vmem:[%s2557_s13 + $0x8] sm:$0xff] %vm1006_vm6, %v1462_v23 }
 0x30c   : > { %v1676_v28 = vpop.f32.mrf.mxu1 }
 0x30d   : > { %v1416_v7 = vadd.f32 %v1676_v28, %v2538_v27 }
 0x30e   : > { %v1407_v17 = vpop.f32.mrf.mxu1 }
 0x30f   : > { %v1436_v8 = vadd.f32 %v1428_v60, %v1416_v7  ;;  %v1408_v25 = vadd.f32 %v2538_v27, %v1407_v17 }
 0x310   : > { %v1677_v53 = vpop.f32.mrf.mxu1 }
 0x311   : > { %vm1444_vm1 = vcmp.gt.f32.partialorder %v1436_v8, 0.0  ;;  %v1459_v1 = vmul.f32 %v2549_v46, %v1436_v8  ;;  %v1434_v44 = vadd.f32 %v1426_v54, %v1408_v25  ;;  %v1419_v0 = vadd.f32 %v1677_v53, %v2538_v27 }
 0x312   : > { %v1410_v24 = vpop.f32.mrf.mxu1 }
 0x313   : > { %v1467_v34 = vsel %vm1444_vm1, %v1436_v8, %v1459_v1  ;;  %vm1442_vm2 = vcmp.gt.f32.partialorder %v1434_v44, 0.0  ;;  %v1457_v36 = vmul.f32 %v2549_v46, %v1434_v44  ;;  %v1437_v16 = vadd.f32 %v1429_v48, %v1419_v0 }
 0x314   : > { %1475 = vst.msk [vmem:[%s2557_s13 + $0x30] sm:$0xff] %vm1006_vm6, %v1467_v34  ;;  %v1411_v55 = vadd.f32 %v2538_v27, %v1410_v24 }
 0x315   : > { %v1465_v63 = vsel %vm1442_vm2, %v1434_v44, %v1457_v36  ;;  %vm1445_vm3 = vcmp.gt.f32.partialorder %v1437_v16, 0.0  ;;  %v1460_v26 = vmul.f32 %v2549_v46, %v1437_v16 }
 0x316   : > { %1473 = vst.msk [vmem:[%s2557_s13 + $0x20] sm:$0xff] %vm1006_vm6, %v1465_v63  ;;  %v1435_v31 = vadd.f32 %v1427_v4, %v1411_v55 }
 0x317   : > { %v1468_v22 = vsel %vm1445_vm3, %v1437_v16, %v1460_v26 }
 0x318   : > { %1476 = vst.msk [vmem:[%s2557_s13 + $0x38] sm:$0xff] %vm1006_vm6, %v1468_v22  ;;  %vm1443_vm4 = vcmp.gt.f32.partialorder %v1435_v31, 0.0  ;;  %v1458_v42 = vmul.f32 %v2549_v46, %v1435_v31 }
 0x31a   : > { %v1466_v10 = vsel %vm1443_vm4, %v1435_v31, %v1458_v42 }
 0x31b   : > { %1474 = vst.msk [vmem:[%s2557_s13 + $0x28] sm:$0xff] %vm1006_vm6, %v1466_v10 }
 0x31c   : > { %1841 = shalt.err (!%p1838_p3)
}
 0x31d   : > { %s1842_s8 = scalar_lea.hbm %s2593_s6, 1024  ;;  %s1846_s15 = scalar_lea.hbm %s2646_s5, 2048 }
 0x31e   : > { %p1843_p4 = scmp.ne.s32.totalorder %s2593_s6, %s1842_s8  ;;  %p1847_p9 = scmp.lt.s32.totalorder %s2593_s6, %s2646_s5 }
 0x31f   : > { %p1848_p10 = scmp.lt.s32.totalorder %s1846_s15, %s1842_s8 }
 0x320   : > { %p1844_p7 = pnand %p1843_p4, %p1969_p5 }
 0x321   : > { %p1849_p11 = por %p1848_p10, %p1847_p9 }
 0x322   : > { %p1845_p8 = pneg %p1844_p7 }
 0x324   : > { %p1850_p12 = pnand %p1849_p11, %p1845_p8 }
 0x326   : > { %1853 = shalt.err (!%p1850_p12)
}
 0x327   : > { %s1899_s13 = smov 128   ;;  %s1900_s23 = smov 8  }
 0x328   : > { %1696 = dma.vmem_to_hbm [thread:$0]  (%p1969_p5), %s2595_s9, 1024, %s2593_s6, %s2601_s22, %s1899_s13, %s1899_s13, %s1900_s23  }
 0x329 PF: > { %p1702_p13 = scmp.ge.s32.totalorder %s1888_s21, 2  ;;  %s1506_s26 = sand.u32 1, %s1876_s18  }
 0x32a   : > { %s1507_s30 = scalar_lea.sflag [#allocation4], %s1506_s26 }
 0x32b   : > { %p1699_p0 = pnand %p1702_p13, %p1973_p6 }
 0x32d   : > { %p1700_p1 = pneg %p1699_p0 }
 0x32f   : > { %1871 = dma.done.wait (%p1700_p1), %s1507_s30, 1024  }
 0x330   : > { %1873 = vsyncadd (%p1700_p1), %s1507_s30, 4294966272  ;;  %p15_p2 = scmp.ge.s32.totalorder %s1956_s24, 4   ;;  %s2653_s18 = smov %s1880_s19 }
 0x331   : > { %s2654_s19 = smov %s1884_s20  ;;  %s2655_s20 = smov %s1967_s27 }
 0x332   : > { %s2656_s21 = smov %s1956_s24  ;;  %17 = sbr.rel (!%p15_p2) target bundleno = 3 (0x3), region = 77 }
 0x337   :  { %1512 = vsyncpa [#allocation4], 1 }
 0x338   :  { %1514 = vsyncpa [#allocation4 + $0x1], 1 }

</bundles_post_ra>
